<compile_context>
chip_gen: v7x
topology: tpu7x:2x2x1
jax: 0.10.0
libtpu: 0.0.40
codegen_flags: <defaults>
</compile_context>

<pallas_src>
import functools

import numpy as np

import jax
import jax.numpy as jnp
from jax import lax
from jax.experimental import pallas as pl
from jax.experimental.pallas import tpu as pltpu


_OFFSETS = tuple((dh, dw) for dh in (-1, 0, 1) for dw in (-1, 0, 1))


def _round_up(x, m):
    return (x + m - 1) // m * m


def _border_masks(H, W):
    """(9, H*W) f32 {0,1} validity masks for the 3x3 / stride-1 / pad-1 taps."""
    p = np.arange(H * W)
    r, c = p // W, p % W
    m = [((r + dh >= 0) & (r + dh < H) & (c + dw >= 0) & (c + dw < W))
         for dh, dw in _OFFSETS]
    return jnp.asarray(np.stack(m).astype(np.float32))


def _taps(z, masks, H, W):
    """Yield the 9 taps tap_k[p] = z_padded[p + dh*W + dw] for one (C, H*W) image.

    The lane rotation's wrap-around pixels are exactly the out-of-image positions,
    which the precomputed border masks zero out (f32 VPU math).
    """
    HW = H * W
    for k, (dh, dw) in enumerate(_OFFSETS):
        s = dh * W + dw
        if s == 0:
            yield k, z
        else:
            yield k, pltpu.roll(z, shift=(-s) % HW, axis=1) * masks[k]


def _bb_kernel_im2col(x_ref, w1_ref, b1_ref, w2_ref, b2_ref, m_ref, out_ref, p_ref,
                      *, nb, H, W, cp):
    """Fused BasicBlock; each conv = one MXU dot against a bf16 im2col scratch."""
    HW = H * W
    masks = [m_ref[k:k + 1, :] for k in range(9)]        # loaded once, reused by both convs

    def fill(get_z):                                     # (9*cp, nb*HW) bf16 patches
        for n in range(nb):
            for k, tap in _taps(get_z(n), masks, H, W):
                p_ref[k * cp:(k + 1) * cp, n * HW:(n + 1) * HW] = tap.astype(p_ref.dtype)

    # conv1 (BN1 scale folded into w1) -> + bias -> relu
    fill(lambda n: x_ref[n])
    y1 = jnp.dot(w1_ref[...], p_ref[...], preferred_element_type=jnp.float32)
    y1 = jnp.maximum(y1 + b1_ref[...], 0.0)

    # conv2 (BN2 scale folded into w2) -> + bias -> + identity -> relu
    fill(lambda n: y1[:, n * HW:(n + 1) * HW])
    y2 = jnp.dot(w2_ref[...], p_ref[...], preferred_element_type=jnp.float32)
    for n in range(nb):
        out_ref[n] = jnp.maximum(y2[:, n * HW:(n + 1) * HW] + b2_ref[...] + x_ref[n],
                                 0.0).astype(out_ref.dtype)


def _bb_kernel_direct(x_ref, w1_ref, b1_ref, w2_ref, b2_ref, m_ref, out_ref,
                      *, nb, H, W):
    """Fused BasicBlock; each conv = 9 accumulating MXU dots (no im2col scratch).

    Preferred for large Cin: K = Cin already fills the MXU and the 9*Cin*HW scratch
    would blow VMEM at production ResNet shapes.
    """
    masks = [m_ref[k:k + 1, :] for k in range(9)]

    def conv(w_ref, z):
        acc = None
        for k, tap in _taps(z, masks, H, W):
            part = jnp.dot(w_ref[k], tap.astype(w_ref.dtype),
                           preferred_element_type=jnp.float32)
            acc = part if acc is None else acc + part
        return acc

    for n in range(nb):
        y1 = jnp.maximum(conv(w1_ref, x_ref[n]) + b1_ref[...], 0.0)
        y2 = conv(w2_ref, y1)
        out_ref[n] = jnp.maximum(y2 + b2_ref[...] + x_ref[n], 0.0).astype(out_ref.dtype)


def _bn_fold(gamma, beta, running_mean, running_var, eps=1e-5):
    scale = gamma / jnp.sqrt(running_var + eps)
    bias = beta - running_mean * scale
    return scale.astype(jnp.float32), bias.astype(jnp.float32)


def basic_block_forward(x_nchw, params, *, matmul_dtype=jnp.bfloat16,
                        out_dtype=jnp.float32, images_per_step=None,
                        im2col_max_cin=96):
    """BasicBlock forward (stride=1, downsample=None). Input/output NCHW."""
    N, Cin, H, W = x_nchw.shape
    w1, w2 = params["w1"], params["w2"]                  # HWIO: (3, 3, Cin, Cout)
    Cout = w1.shape[3]
    if Cin != Cout:
        raise ValueError("BasicBlock with downsample=None requires inplanes == planes")

    HW = H * W
    Cp = _round_up(Cout, 16)                             # bf16 sublane-packing alignment
    use_scratch = Cin < im2col_max_cin                   # im2col only pays off for small K

    s1, b1 = _bn_fold(params["gamma1"], params["beta1"], params["mean1"], params["var1"])
    s2, b2 = _bn_fold(params["gamma2"], params["beta2"], params["mean2"], params["var2"])

    def fold_weight(w, s):
        # Fold BN scale, zero-pad channels to Cp, lay out for the kernel's matmul(s).
        wp = jnp.pad(w * s, ((0, 0), (0, 0), (0, Cp - Cin), (0, Cp - Cout)))
        if use_scratch:                                  # (Cp_out, 9*Cp_in), cols = (kh,kw,cin)
            return wp.reshape(9 * Cp, Cp).T.astype(matmul_dtype)
        return wp.reshape(9, Cp, Cp).transpose(0, 2, 1).astype(matmul_dtype)  # (9, Co, Ci)

    w1m, w2m = fold_weight(w1, s1), fold_weight(w2, s2)
    b1c = jnp.pad(b1, (0, Cp - Cout)).reshape(Cp, 1)
    b2c = jnp.pad(b2, (0, Cp - Cout)).reshape(Cp, 1)
    masks = _border_masks(H, W)                          # (9, HW) f32, resident in VMEM

    # NCHW -> (N, Cp, H*W): reshape + channel zero-pad only (no transpose, no spatial pad);
    # H*W is the lane dimension.
    x_flat = jnp.pad(x_nchw.astype(jnp.float32).reshape(N, Cin, HW),
                     ((0, 0), (0, Cp - Cin), (0, 0)))

    # Images per grid step: fold the whole batch into one step when the footprint is
    # small (single-TC v5e/v6e: per-step overhead dominates and the MXU lane dim becomes
    # nb*HW); keep one image per step otherwise so big shapes / multi-core chips pipeline.
    if images_per_step is None:
        per_image = 2 * Cp * HW * 4 + (9 * Cp * HW * 2 if use_scratch else 0)
        images_per_step = N if N * per_image <= (8 << 20) else 1
    nb = images_per_step if (images_per_step > 0 and N % images_per_step == 0) else 1
    grid = (N // nb,)

    if use_scratch:
        kernel = functools.partial(_bb_kernel_im2col, nb=nb, H=H, W=W, cp=Cp)
        w_spec = pl.BlockSpec((Cp, 9 * Cp), lambda g: (0, 0))
        scratch_shapes = [pltpu.VMEM((9 * Cp, nb * HW), jnp.bfloat16)]
    else:
        kernel = functools.partial(_bb_kernel_direct, nb=nb, H=H, W=W)
        w_spec = pl.BlockSpec((9, Cp, Cp), lambda g: (0, 0, 0))
        scratch_shapes = []

    flops = 4 * N * HW * 9 * Cp * Cp                     # two 3x3 convs (2*MACs each)
    bytes_accessed = (x_flat.size * 4 + N * Cp * HW * jnp.dtype(out_dtype).itemsize
                      + (w1m.size + w2m.size) * jnp.dtype(matmul_dtype).itemsize
                      + (b1c.size + b2c.size + masks.size) * 4)

    # VMEM: double-buffered x/out blocks + resident weights/biases/masks + scratch.
    need = (2 * nb * Cp * HW * (4 + jnp.dtype(out_dtype).itemsize)
            + (w1m.size + w2m.size) * jnp.dtype(matmul_dtype).itemsize
            + (b1c.size + b2c.size + masks.size) * 4
            + (9 * Cp * nb * HW * 2 if use_scratch else 0))
    vmem_limit = int(max(32 << 20, min(96 << 20, 4 * need)))

    out_flat = pl.pallas_call(
        kernel,
        out_shape=jax.ShapeDtypeStruct((N, Cp, HW), out_dtype),
        grid=grid,
        in_specs=[
            pl.BlockSpec((nb, Cp, HW), lambda g: (g, 0, 0)),   # x, lane-dense
            w_spec,                                            # w1 (resident)
            pl.BlockSpec((Cp, 1), lambda g: (0, 0)),           # bias1
            w_spec,                                            # w2 (resident)
            pl.BlockSpec((Cp, 1), lambda g: (0, 0)),           # bias2
            pl.BlockSpec((9, HW), lambda g: (0, 0)),           # border masks (resident)
        ],
        out_specs=pl.BlockSpec((nb, Cp, HW), lambda g: (g, 0, 0)),  # lane-dense output
        scratch_shapes=scratch_shapes,
        compiler_params=pltpu.CompilerParams(
            dimension_semantics=("parallel",),
            vmem_limit_bytes=vmem_limit),
        cost_estimate=pl.CostEstimate(flops=flops, transcendentals=0,
                                      bytes_accessed=bytes_accessed),
    )(x_flat, w1m, b1c, w2m, b2c, masks)

    return out_flat[:, :Cout, :].reshape(N, Cout, H, W)    # drop padded channels; NCHW


def _reference_forward(x_nchw, params, *, matmul_dtype=jnp.bfloat16):
    """Pure-JAX reference (lax conv) mirroring the kernel's dtype policy:
    bf16 MXU operands, f32 accumulation, f32 elementwise / BN / identity math."""
    x = jnp.transpose(x_nchw, (0, 2, 3, 1)).astype(jnp.float32)   # NHWC
    s1, b1 = _bn_fold(params["gamma1"], params["beta1"], params["mean1"], params["var1"])
    s2, b2 = _bn_fold(params["gamma2"], params["beta2"], params["mean2"], params["var2"])
    w1s = (params["w1"] * s1).astype(matmul_dtype)
    w2s = (params["w2"] * s2).astype(matmul_dtype)
    dn = ("NHWC", "HWIO", "NHWC")
    o = lax.conv_general_dilated(x.astype(matmul_dtype), w1s, (1, 1), "SAME",
                                 dimension_numbers=dn,
                                 preferred_element_type=jnp.float32)
    o = jnp.maximum(o + b1, 0.0)
    o = lax.conv_general_dilated(o.astype(matmul_dtype), w2s, (1, 1), "SAME",
                                 dimension_numbers=dn,
                                 preferred_element_type=jnp.float32)
    o = jnp.maximum(o + b2 + x, 0.0)
    return jnp.transpose(o, (0, 3, 1, 2))


def init_params(key, inplanes, planes):
    ks = jax.random.split(key, 6)
    return {
        # conv weights in HWIO layout: (3, 3, Cin, Cout)
        "w1": 0.1 * jax.random.normal(ks[0], (3, 3, inplanes, planes), jnp.float32),
        "w2": 0.1 * jax.random.normal(ks[1], (3, 3, planes, planes), jnp.float32),
        "gamma1": 1.0 + 0.1 * jax.random.normal(ks[2], (planes,), jnp.float32),
        "beta1": 0.1 * jax.random.normal(ks[3], (planes,), jnp.float32),
        "mean1": 0.05 * jax.random.normal(ks[4], (planes,), jnp.float32),
        "var1": 1.0 + 0.1 * jnp.abs(jax.random.normal(ks[5], (planes,), jnp.float32)),
        "gamma2": jnp.ones((planes,), jnp.float32),
        "beta2": jnp.zeros((planes,), jnp.float32),
        "mean2": jnp.zeros((planes,), jnp.float32),
        "var2": jnp.ones((planes,), jnp.float32),
    }


if __name__ == "__main__":
    key = jax.random.PRNGKey(0)
    kx, kp = jax.random.split(key)

    N, C, Hs, Ws = 2, 4, 16, 16                    # inplanes = planes = 4, stride = 1
    x = jax.random.normal(kx, (N, C, Hs, Ws), jnp.float32)   # NCHW, like PyTorch
    params = init_params(kp, inplanes=C, planes=C)

    ref = _reference_forward(x, params)

    # Main path: whole batch folded into one grid step, bf16 im2col scratch.
    out = jax.block_until_ready(basic_block_forward(x, params))
    assert out.shape == (N, C, Hs, Ws)
    assert jnp.allclose(out, ref, atol=1e-2, rtol=1e-2), "im2col path mismatch vs reference"

    # Also exercise the no-scratch path (9 accumulating dots, used for large Cin).
    out_d = jax.block_until_ready(basic_block_forward(x, params, im2col_max_cin=0))
    assert jnp.allclose(out_d, ref, atol=1e-2, rtol=1e-2), "direct path mismatch vs reference"

    # And the multi-step grid path (one image per step, as used on v7x / big batches).
    out_g = jax.block_until_ready(basic_block_forward(x, params, images_per_step=1))
    assert jnp.allclose(out_g, ref, atol=1e-2, rtol=1e-2), "per-image grid path mismatch"

    print("KERNEL_OK")
</pallas_src>

<mosaic_0001>
module attributes {stable_mosaic.version = 11 : i64} {
  func.func @_bb_kernel_im2col(%arg0: i32, %arg1: memref<2x16x256xf32, #tpu.memory_space<vmem>>, %arg2: memref<16x144xbf16, #tpu.memory_space<vmem>>, %arg3: memref<16x1xf32, #tpu.memory_space<vmem>>, %arg4: memref<16x144xbf16, #tpu.memory_space<vmem>>, %arg5: memref<16x1xf32, #tpu.memory_space<vmem>>, %arg6: memref<9x256xf32, #tpu.memory_space<vmem>>, %arg7: memref<2x16x256xf32, #tpu.memory_space<vmem>>, %arg8: memref<144x512xbf16, #tpu.memory_space<vmem>>) attributes {dimension_semantics = [#tpu.dimension_semantics<parallel>], iteration_bounds = array<i64: 1>, scalar_prefetch = 0 : i64, scratch_operands = 1 : i64, tpu.core_type = #tpu.core_type<tc>, window_params = [{transform_indices = @transform_0, window_bounds = array<i64: 2, 16, 256>}, {pipeline_mode = #tpu.pipeline_mode<synchronous>, transform_indices = @transform_1, window_bounds = array<i64: 16, 144>}, {pipeline_mode = #tpu.pipeline_mode<synchronous>, transform_indices = @transform_2, window_bounds = array<i64: 16, 1>}, {pipeline_mode = #tpu.pipeline_mode<synchronous>, transform_indices = @transform_3, window_bounds = array<i64: 16, 144>}, {pipeline_mode = #tpu.pipeline_mode<synchronous>, transform_indices = @transform_4, window_bounds = array<i64: 16, 1>}, {pipeline_mode = #tpu.pipeline_mode<synchronous>, transform_indices = @transform_5, window_bounds = array<i64: 9, 256>}, {transform_indices = @transform_6, window_bounds = array<i64: 2, 16, 256>}]} {
    %c0 = arith.constant 0 : index
    %c0_0 = arith.constant 0 : index
    %0 = vector.load %arg6[%c0, %c0_0] : memref<9x256xf32, #tpu.memory_space<vmem>>, vector<1x256xf32>
    %c1 = arith.constant 1 : index
    %c0_1 = arith.constant 0 : index
    %1 = vector.load %arg6[%c1, %c0_1] : memref<9x256xf32, #tpu.memory_space<vmem>>, vector<1x256xf32>
    %c2 = arith.constant 2 : index
    %c0_2 = arith.constant 0 : index
    %2 = vector.load %arg6[%c2, %c0_2] : memref<9x256xf32, #tpu.memory_space<vmem>>, vector<1x256xf32>
    %c3 = arith.constant 3 : index
    %c0_3 = arith.constant 0 : index
    %3 = vector.load %arg6[%c3, %c0_3] : memref<9x256xf32, #tpu.memory_space<vmem>>, vector<1x256xf32>
    %c5 = arith.constant 5 : index
    %c0_4 = arith.constant 0 : index
    %4 = vector.load %arg6[%c5, %c0_4] : memref<9x256xf32, #tpu.memory_space<vmem>>, vector<1x256xf32>
    %c6 = arith.constant 6 : index
    %c0_5 = arith.constant 0 : index
    %5 = vector.load %arg6[%c6, %c0_5] : memref<9x256xf32, #tpu.memory_space<vmem>>, vector<1x256xf32>
    %c7 = arith.constant 7 : index
    %c0_6 = arith.constant 0 : index
    %6 = vector.load %arg6[%c7, %c0_6] : memref<9x256xf32, #tpu.memory_space<vmem>>, vector<1x256xf32>
    %c8 = arith.constant 8 : index
    %c0_7 = arith.constant 0 : index
    %7 = vector.load %arg6[%c8, %c0_7] : memref<9x256xf32, #tpu.memory_space<vmem>>, vector<1x256xf32>
    %c0_8 = arith.constant 0 : index
    %c0_9 = arith.constant 0 : index
    %c0_10 = arith.constant 0 : index
    %8 = vector.load %arg1[%c0_8, %c0_9, %c0_10] : memref<2x16x256xf32, #tpu.memory_space<vmem>>, vector<1x16x256xf32>
    %9 = vector.shape_cast %8 : vector<1x16x256xf32> to vector<16x256xf32>
    %c17_i32 = arith.constant 17 : i32
    %10 = tpu.dynamic_rotate %9 by %c17_i32 dim 1 : vector<16x256xf32>, i32 -> vector<16x256xf32>
    %11 = vector.broadcast %0 : vector<1x256xf32> to vector<16x256xf32>
    %12 = arith.mulf %10, %11 : vector<16x256xf32>
    %13 = arith.truncf %12 : vector<16x256xf32> to vector<16x256xbf16>
    %c0_11 = arith.constant 0 : index
    %c0_12 = arith.constant 0 : index
    %14 = vector.load %arg8[%c0_11, %c0_12] : memref<144x512xbf16, #tpu.memory_space<vmem>>, vector<16x256xbf16>
    tpu.vector_store %arg8[%c0_11, %c0_12], %13 {strides = array<i32>} : memref<144x512xbf16, #tpu.memory_space<vmem>>, vector<16x256xbf16>,
    %c16_i32 = arith.constant 16 : i32
    %15 = tpu.dynamic_rotate %9 by %c16_i32 dim 1 : vector<16x256xf32>, i32 -> vector<16x256xf32>
    %16 = vector.broadcast %1 : vector<1x256xf32> to vector<16x256xf32>
    %17 = arith.mulf %15, %16 : vector<16x256xf32>
    %18 = arith.truncf %17 : vector<16x256xf32> to vector<16x256xbf16>
    %c16 = arith.constant 16 : index
    %c0_13 = arith.constant 0 : index
    %19 = vector.load %arg8[%c16, %c0_13] : memref<144x512xbf16, #tpu.memory_space<vmem>>, vector<16x256xbf16>
    tpu.vector_store %arg8[%c16, %c0_13], %18 {strides = array<i32>} : memref<144x512xbf16, #tpu.memory_space<vmem>>, vector<16x256xbf16>,
    %c15_i32 = arith.constant 15 : i32
    %20 = tpu.dynamic_rotate %9 by %c15_i32 dim 1 : vector<16x256xf32>, i32 -> vector<16x256xf32>
    %21 = vector.broadcast %2 : vector<1x256xf32> to vector<16x256xf32>
    %22 = arith.mulf %20, %21 : vector<16x256xf32>
    %23 = arith.truncf %22 : vector<16x256xf32> to vector<16x256xbf16>
    %c32 = arith.constant 32 : index
    %c0_14 = arith.constant 0 : index
    %24 = vector.load %arg8[%c32, %c0_14] : memref<144x512xbf16, #tpu.memory_space<vmem>>, vector<16x256xbf16>
    tpu.vector_store %arg8[%c32, %c0_14], %23 {strides = array<i32>} : memref<144x512xbf16, #tpu.memory_space<vmem>>, vector<16x256xbf16>,
    %c1_i32 = arith.constant 1 : i32
    %25 = tpu.dynamic_rotate %9 by %c1_i32 dim 1 : vector<16x256xf32>, i32 -> vector<16x256xf32>
    %26 = vector.broadcast %3 : vector<1x256xf32> to vector<16x256xf32>
    %27 = arith.mulf %25, %26 : vector<16x256xf32>
    %28 = arith.truncf %27 : vector<16x256xf32> to vector<16x256xbf16>
    %c48 = arith.constant 48 : index
    %c0_15 = arith.constant 0 : index
    %29 = vector.load %arg8[%c48, %c0_15] : memref<144x512xbf16, #tpu.memory_space<vmem>>, vector<16x256xbf16>
    tpu.vector_store %arg8[%c48, %c0_15], %28 {strides = array<i32>} : memref<144x512xbf16, #tpu.memory_space<vmem>>, vector<16x256xbf16>,
    %30 = arith.truncf %9 : vector<16x256xf32> to vector<16x256xbf16>
    %c64 = arith.constant 64 : index
    %c0_16 = arith.constant 0 : index
    %31 = vector.load %arg8[%c64, %c0_16] : memref<144x512xbf16, #tpu.memory_space<vmem>>, vector<16x256xbf16>
    tpu.vector_store %arg8[%c64, %c0_16], %30 {strides = array<i32>} : memref<144x512xbf16, #tpu.memory_space<vmem>>, vector<16x256xbf16>,
    %c255_i32 = arith.constant 255 : i32
    %32 = tpu.dynamic_rotate %9 by %c255_i32 dim 1 : vector<16x256xf32>, i32 -> vector<16x256xf32>
    %33 = vector.broadcast %4 : vector<1x256xf32> to vector<16x256xf32>
    %34 = arith.mulf %32, %33 : vector<16x256xf32>
    %35 = arith.truncf %34 : vector<16x256xf32> to vector<16x256xbf16>
    %c80 = arith.constant 80 : index
    %c0_17 = arith.constant 0 : index
    %36 = vector.load %arg8[%c80, %c0_17] : memref<144x512xbf16, #tpu.memory_space<vmem>>, vector<16x256xbf16>
    tpu.vector_store %arg8[%c80, %c0_17], %35 {strides = array<i32>} : memref<144x512xbf16, #tpu.memory_space<vmem>>, vector<16x256xbf16>,
    %c241_i32 = arith.constant 241 : i32
    %37 = tpu.dynamic_rotate %9 by %c241_i32 dim 1 : vector<16x256xf32>, i32 -> vector<16x256xf32>
    %38 = vector.broadcast %5 : vector<1x256xf32> to vector<16x256xf32>
    %39 = arith.mulf %37, %38 : vector<16x256xf32>
    %40 = arith.truncf %39 : vector<16x256xf32> to vector<16x256xbf16>
    %c96 = arith.constant 96 : index
    %c0_18 = arith.constant 0 : index
    %41 = vector.load %arg8[%c96, %c0_18] : memref<144x512xbf16, #tpu.memory_space<vmem>>, vector<16x256xbf16>
    tpu.vector_store %arg8[%c96, %c0_18], %40 {strides = array<i32>} : memref<144x512xbf16, #tpu.memory_space<vmem>>, vector<16x256xbf16>,
    %c240_i32 = arith.constant 240 : i32
    %42 = tpu.dynamic_rotate %9 by %c240_i32 dim 1 : vector<16x256xf32>, i32 -> vector<16x256xf32>
    %43 = vector.broadcast %6 : vector<1x256xf32> to vector<16x256xf32>
    %44 = arith.mulf %42, %43 : vector<16x256xf32>
    %45 = arith.truncf %44 : vector<16x256xf32> to vector<16x256xbf16>
    %c112 = arith.constant 112 : index
    %c0_19 = arith.constant 0 : index
    %46 = vector.load %arg8[%c112, %c0_19] : memref<144x512xbf16, #tpu.memory_space<vmem>>, vector<16x256xbf16>
    tpu.vector_store %arg8[%c112, %c0_19], %45 {strides = array<i32>} : memref<144x512xbf16, #tpu.memory_space<vmem>>, vector<16x256xbf16>,
    %c239_i32 = arith.constant 239 : i32
    %47 = tpu.dynamic_rotate %9 by %c239_i32 dim 1 : vector<16x256xf32>, i32 -> vector<16x256xf32>
    %48 = vector.broadcast %7 : vector<1x256xf32> to vector<16x256xf32>
    %49 = arith.mulf %47, %48 : vector<16x256xf32>
    %50 = arith.truncf %49 : vector<16x256xf32> to vector<16x256xbf16>
    %c128 = arith.constant 128 : index
    %c0_20 = arith.constant 0 : index
    %51 = vector.load %arg8[%c128, %c0_20] : memref<144x512xbf16, #tpu.memory_space<vmem>>, vector<16x256xbf16>
    tpu.vector_store %arg8[%c128, %c0_20], %50 {strides = array<i32>} : memref<144x512xbf16, #tpu.memory_space<vmem>>, vector<16x256xbf16>,
    %c1_21 = arith.constant 1 : index
    %c0_22 = arith.constant 0 : index
    %c0_23 = arith.constant 0 : index
    %52 = vector.load %arg1[%c1_21, %c0_22, %c0_23] : memref<2x16x256xf32, #tpu.memory_space<vmem>>, vector<1x16x256xf32>
    %53 = vector.shape_cast %52 : vector<1x16x256xf32> to vector<16x256xf32>
    %c17_i32_24 = arith.constant 17 : i32
    %54 = tpu.dynamic_rotate %53 by %c17_i32_24 dim 1 : vector<16x256xf32>, i32 -> vector<16x256xf32>
    %55 = vector.broadcast %0 : vector<1x256xf32> to vector<16x256xf32>
    %56 = arith.mulf %54, %55 : vector<16x256xf32>
    %57 = arith.truncf %56 : vector<16x256xf32> to vector<16x256xbf16>
    %c0_25 = arith.constant 0 : index
    %c256 = arith.constant 256 : index
    %58 = vector.load %arg8[%c0_25, %c256] : memref<144x512xbf16, #tpu.memory_space<vmem>>, vector<16x256xbf16>
    tpu.vector_store %arg8[%c0_25, %c256], %57 {strides = array<i32>} : memref<144x512xbf16, #tpu.memory_space<vmem>>, vector<16x256xbf16>,
    %c16_i32_26 = arith.constant 16 : i32
    %59 = tpu.dynamic_rotate %53 by %c16_i32_26 dim 1 : vector<16x256xf32>, i32 -> vector<16x256xf32>
    %60 = vector.broadcast %1 : vector<1x256xf32> to vector<16x256xf32>
    %61 = arith.mulf %59, %60 : vector<16x256xf32>
    %62 = arith.truncf %61 : vector<16x256xf32> to vector<16x256xbf16>
    %c16_27 = arith.constant 16 : index
    %c256_28 = arith.constant 256 : index
    %63 = vector.load %arg8[%c16_27, %c256_28] : memref<144x512xbf16, #tpu.memory_space<vmem>>, vector<16x256xbf16>
    tpu.vector_store %arg8[%c16_27, %c256_28], %62 {strides = array<i32>} : memref<144x512xbf16, #tpu.memory_space<vmem>>, vector<16x256xbf16>,
    %c15_i32_29 = arith.constant 15 : i32
    %64 = tpu.dynamic_rotate %53 by %c15_i32_29 dim 1 : vector<16x256xf32>, i32 -> vector<16x256xf32>
    %65 = vector.broadcast %2 : vector<1x256xf32> to vector<16x256xf32>
    %66 = arith.mulf %64, %65 : vector<16x256xf32>
    %67 = arith.truncf %66 : vector<16x256xf32> to vector<16x256xbf16>
    %c32_30 = arith.constant 32 : index
    %c256_31 = arith.constant 256 : index
    %68 = vector.load %arg8[%c32_30, %c256_31] : memref<144x512xbf16, #tpu.memory_space<vmem>>, vector<16x256xbf16>
    tpu.vector_store %arg8[%c32_30, %c256_31], %67 {strides = array<i32>} : memref<144x512xbf16, #tpu.memory_space<vmem>>, vector<16x256xbf16>,
    %c1_i32_32 = arith.constant 1 : i32
    %69 = tpu.dynamic_rotate %53 by %c1_i32_32 dim 1 : vector<16x256xf32>, i32 -> vector<16x256xf32>
    %70 = vector.broadcast %3 : vector<1x256xf32> to vector<16x256xf32>
    %71 = arith.mulf %69, %70 : vector<16x256xf32>
    %72 = arith.truncf %71 : vector<16x256xf32> to vector<16x256xbf16>
    %c48_33 = arith.constant 48 : index
    %c256_34 = arith.constant 256 : index
    %73 = vector.load %arg8[%c48_33, %c256_34] : memref<144x512xbf16, #tpu.memory_space<vmem>>, vector<16x256xbf16>
    tpu.vector_store %arg8[%c48_33, %c256_34], %72 {strides = array<i32>} : memref<144x512xbf16, #tpu.memory_space<vmem>>, vector<16x256xbf16>,
    %74 = arith.truncf %53 : vector<16x256xf32> to vector<16x256xbf16>
    %c64_35 = arith.constant 64 : index
    %c256_36 = arith.constant 256 : index
    %75 = vector.load %arg8[%c64_35, %c256_36] : memref<144x512xbf16, #tpu.memory_space<vmem>>, vector<16x256xbf16>
    tpu.vector_store %arg8[%c64_35, %c256_36], %74 {strides = array<i32>} : memref<144x512xbf16, #tpu.memory_space<vmem>>, vector<16x256xbf16>,
    %c255_i32_37 = arith.constant 255 : i32
    %76 = tpu.dynamic_rotate %53 by %c255_i32_37 dim 1 : vector<16x256xf32>, i32 -> vector<16x256xf32>
    %77 = vector.broadcast %4 : vector<1x256xf32> to vector<16x256xf32>
    %78 = arith.mulf %76, %77 : vector<16x256xf32>
    %79 = arith.truncf %78 : vector<16x256xf32> to vector<16x256xbf16>
    %c80_38 = arith.constant 80 : index
    %c256_39 = arith.constant 256 : index
    %80 = vector.load %arg8[%c80_38, %c256_39] : memref<144x512xbf16, #tpu.memory_space<vmem>>, vector<16x256xbf16>
    tpu.vector_store %arg8[%c80_38, %c256_39], %79 {strides = array<i32>} : memref<144x512xbf16, #tpu.memory_space<vmem>>, vector<16x256xbf16>,
    %c241_i32_40 = arith.constant 241 : i32
    %81 = tpu.dynamic_rotate %53 by %c241_i32_40 dim 1 : vector<16x256xf32>, i32 -> vector<16x256xf32>
    %82 = vector.broadcast %5 : vector<1x256xf32> to vector<16x256xf32>
    %83 = arith.mulf %81, %82 : vector<16x256xf32>
    %84 = arith.truncf %83 : vector<16x256xf32> to vector<16x256xbf16>
    %c96_41 = arith.constant 96 : index
    %c256_42 = arith.constant 256 : index
    %85 = vector.load %arg8[%c96_41, %c256_42] : memref<144x512xbf16, #tpu.memory_space<vmem>>, vector<16x256xbf16>
    tpu.vector_store %arg8[%c96_41, %c256_42], %84 {strides = array<i32>} : memref<144x512xbf16, #tpu.memory_space<vmem>>, vector<16x256xbf16>,
    %c240_i32_43 = arith.constant 240 : i32
    %86 = tpu.dynamic_rotate %53 by %c240_i32_43 dim 1 : vector<16x256xf32>, i32 -> vector<16x256xf32>
    %87 = vector.broadcast %6 : vector<1x256xf32> to vector<16x256xf32>
    %88 = arith.mulf %86, %87 : vector<16x256xf32>
    %89 = arith.truncf %88 : vector<16x256xf32> to vector<16x256xbf16>
    %c112_44 = arith.constant 112 : index
    %c256_45 = arith.constant 256 : index
    %90 = vector.load %arg8[%c112_44, %c256_45] : memref<144x512xbf16, #tpu.memory_space<vmem>>, vector<16x256xbf16>
    tpu.vector_store %arg8[%c112_44, %c256_45], %89 {strides = array<i32>} : memref<144x512xbf16, #tpu.memory_space<vmem>>, vector<16x256xbf16>,
    %c239_i32_46 = arith.constant 239 : i32
    %91 = tpu.dynamic_rotate %53 by %c239_i32_46 dim 1 : vector<16x256xf32>, i32 -> vector<16x256xf32>
    %92 = vector.broadcast %7 : vector<1x256xf32> to vector<16x256xf32>
    %93 = arith.mulf %91, %92 : vector<16x256xf32>
    %94 = arith.truncf %93 : vector<16x256xf32> to vector<16x256xbf16>
    %c128_47 = arith.constant 128 : index
    %c256_48 = arith.constant 256 : index
    %95 = vector.load %arg8[%c128_47, %c256_48] : memref<144x512xbf16, #tpu.memory_space<vmem>>, vector<16x256xbf16>
    tpu.vector_store %arg8[%c128_47, %c256_48], %94 {strides = array<i32>} : memref<144x512xbf16, #tpu.memory_space<vmem>>, vector<16x256xbf16>,
    %c0_49 = arith.constant 0 : index
    %c0_50 = arith.constant 0 : index
    %96 = vector.load %arg2[%c0_49, %c0_50] : memref<16x144xbf16, #tpu.memory_space<vmem>>, vector<16x144xbf16>
    %c0_51 = arith.constant 0 : index
    %c0_52 = arith.constant 0 : index
    %97 = vector.load %arg8[%c0_51, %c0_52] : memref<144x512xbf16, #tpu.memory_space<vmem>>, vector<144x512xbf16>
    %cst = arith.constant dense<0.000000e+00> : vector<16x512xf32>
    %98 = tpu.matmul %96, %97, %cst {dimension_numbers = #tpu.dot_dimension_numbers<[1], [0], [0], [1], [0, 0, 1, 1], [], []>} : vector<16x144xbf16>, vector<144x512xbf16>, vector<16x512xf32> -> vector<16x512xf32>
    %c0_53 = arith.constant 0 : index
    %c0_54 = arith.constant 0 : index
    %99 = vector.load %arg3[%c0_53, %c0_54] : memref<16x1xf32, #tpu.memory_space<vmem>>, vector<16x1xf32>
    %100 = vector.broadcast %99 : vector<16x1xf32> to vector<16x512xf32>
    %101 = arith.addf %98, %100 : vector<16x512xf32>
    %cst_55 = arith.constant 0.000000e+00 : f32
    %102 = vector.broadcast %cst_55 : f32 to vector<16x512xf32>
    %103 = arith.maximumf %101, %102 : vector<16x512xf32>
    %104 = vector.extract_strided_slice %103 {offsets = [0, 0], sizes = [16, 256], strides = [1, 1]} : vector<16x512xf32> to vector<16x256xf32>
    %c17_i32_56 = arith.constant 17 : i32
    %105 = tpu.dynamic_rotate %104 by %c17_i32_56 dim 1 : vector<16x256xf32>, i32 -> vector<16x256xf32>
    %106 = vector.broadcast %0 : vector<1x256xf32> to vector<16x256xf32>
    %107 = arith.mulf %105, %106 : vector<16x256xf32>
    %108 = arith.truncf %107 : vector<16x256xf32> to vector<16x256xbf16>
    %c0_57 = arith.constant 0 : index
    %c0_58 = arith.constant 0 : index
    %109 = vector.load %arg8[%c0_57, %c0_58] : memref<144x512xbf16, #tpu.memory_space<vmem>>, vector<16x256xbf16>
    tpu.vector_store %arg8[%c0_57, %c0_58], %108 {strides = array<i32>} : memref<144x512xbf16, #tpu.memory_space<vmem>>, vector<16x256xbf16>,
    %c16_i32_59 = arith.constant 16 : i32
    %110 = tpu.dynamic_rotate %104 by %c16_i32_59 dim 1 : vector<16x256xf32>, i32 -> vector<16x256xf32>
    %111 = vector.broadcast %1 : vector<1x256xf32> to vector<16x256xf32>
    %112 = arith.mulf %110, %111 : vector<16x256xf32>
    %113 = arith.truncf %112 : vector<16x256xf32> to vector<16x256xbf16>
    %c16_60 = arith.constant 16 : index
    %c0_61 = arith.constant 0 : index
    %114 = vector.load %arg8[%c16_60, %c0_61] : memref<144x512xbf16, #tpu.memory_space<vmem>>, vector<16x256xbf16>
    tpu.vector_store %arg8[%c16_60, %c0_61], %113 {strides = array<i32>} : memref<144x512xbf16, #tpu.memory_space<vmem>>, vector<16x256xbf16>,
    %c15_i32_62 = arith.constant 15 : i32
    %115 = tpu.dynamic_rotate %104 by %c15_i32_62 dim 1 : vector<16x256xf32>, i32 -> vector<16x256xf32>
    %116 = vector.broadcast %2 : vector<1x256xf32> to vector<16x256xf32>
    %117 = arith.mulf %115, %116 : vector<16x256xf32>
    %118 = arith.truncf %117 : vector<16x256xf32> to vector<16x256xbf16>
    %c32_63 = arith.constant 32 : index
    %c0_64 = arith.constant 0 : index
    %119 = vector.load %arg8[%c32_63, %c0_64] : memref<144x512xbf16, #tpu.memory_space<vmem>>, vector<16x256xbf16>
    tpu.vector_store %arg8[%c32_63, %c0_64], %118 {strides = array<i32>} : memref<144x512xbf16, #tpu.memory_space<vmem>>, vector<16x256xbf16>,
    %c1_i32_65 = arith.constant 1 : i32
    %120 = tpu.dynamic_rotate %104 by %c1_i32_65 dim 1 : vector<16x256xf32>, i32 -> vector<16x256xf32>
    %121 = vector.broadcast %3 : vector<1x256xf32> to vector<16x256xf32>
    %122 = arith.mulf %120, %121 : vector<16x256xf32>
    %123 = arith.truncf %122 : vector<16x256xf32> to vector<16x256xbf16>
    %c48_66 = arith.constant 48 : index
    %c0_67 = arith.constant 0 : index
    %124 = vector.load %arg8[%c48_66, %c0_67] : memref<144x512xbf16, #tpu.memory_space<vmem>>, vector<16x256xbf16>
    tpu.vector_store %arg8[%c48_66, %c0_67], %123 {strides = array<i32>} : memref<144x512xbf16, #tpu.memory_space<vmem>>, vector<16x256xbf16>,
    %125 = arith.truncf %104 : vector<16x256xf32> to vector<16x256xbf16>
    %c64_68 = arith.constant 64 : index
    %c0_69 = arith.constant 0 : index
    %126 = vector.load %arg8[%c64_68, %c0_69] : memref<144x512xbf16, #tpu.memory_space<vmem>>, vector<16x256xbf16>
    tpu.vector_store %arg8[%c64_68, %c0_69], %125 {strides = array<i32>} : memref<144x512xbf16, #tpu.memory_space<vmem>>, vector<16x256xbf16>,
    %c255_i32_70 = arith.constant 255 : i32
    %127 = tpu.dynamic_rotate %104 by %c255_i32_70 dim 1 : vector<16x256xf32>, i32 -> vector<16x256xf32>
    %128 = vector.broadcast %4 : vector<1x256xf32> to vector<16x256xf32>
    %129 = arith.mulf %127, %128 : vector<16x256xf32>
    %130 = arith.truncf %129 : vector<16x256xf32> to vector<16x256xbf16>
    %c80_71 = arith.constant 80 : index
    %c0_72 = arith.constant 0 : index
    %131 = vector.load %arg8[%c80_71, %c0_72] : memref<144x512xbf16, #tpu.memory_space<vmem>>, vector<16x256xbf16>
    tpu.vector_store %arg8[%c80_71, %c0_72], %130 {strides = array<i32>} : memref<144x512xbf16, #tpu.memory_space<vmem>>, vector<16x256xbf16>,
    %c241_i32_73 = arith.constant 241 : i32
    %132 = tpu.dynamic_rotate %104 by %c241_i32_73 dim 1 : vector<16x256xf32>, i32 -> vector<16x256xf32>
    %133 = vector.broadcast %5 : vector<1x256xf32> to vector<16x256xf32>
    %134 = arith.mulf %132, %133 : vector<16x256xf32>
    %135 = arith.truncf %134 : vector<16x256xf32> to vector<16x256xbf16>
    %c96_74 = arith.constant 96 : index
    %c0_75 = arith.constant 0 : index
    %136 = vector.load %arg8[%c96_74, %c0_75] : memref<144x512xbf16, #tpu.memory_space<vmem>>, vector<16x256xbf16>
    tpu.vector_store %arg8[%c96_74, %c0_75], %135 {strides = array<i32>} : memref<144x512xbf16, #tpu.memory_space<vmem>>, vector<16x256xbf16>,
    %c240_i32_76 = arith.constant 240 : i32
    %137 = tpu.dynamic_rotate %104 by %c240_i32_76 dim 1 : vector<16x256xf32>, i32 -> vector<16x256xf32>
    %138 = vector.broadcast %6 : vector<1x256xf32> to vector<16x256xf32>
    %139 = arith.mulf %137, %138 : vector<16x256xf32>
    %140 = arith.truncf %139 : vector<16x256xf32> to vector<16x256xbf16>
    %c112_77 = arith.constant 112 : index
    %c0_78 = arith.constant 0 : index
    %141 = vector.load %arg8[%c112_77, %c0_78] : memref<144x512xbf16, #tpu.memory_space<vmem>>, vector<16x256xbf16>
    tpu.vector_store %arg8[%c112_77, %c0_78], %140 {strides = array<i32>} : memref<144x512xbf16, #tpu.memory_space<vmem>>, vector<16x256xbf16>,
    %c239_i32_79 = arith.constant 239 : i32
    %142 = tpu.dynamic_rotate %104 by %c239_i32_79 dim 1 : vector<16x256xf32>, i32 -> vector<16x256xf32>
    %143 = vector.broadcast %7 : vector<1x256xf32> to vector<16x256xf32>
    %144 = arith.mulf %142, %143 : vector<16x256xf32>
    %145 = arith.truncf %144 : vector<16x256xf32> to vector<16x256xbf16>
    %c128_80 = arith.constant 128 : index
    %c0_81 = arith.constant 0 : index
    %146 = vector.load %arg8[%c128_80, %c0_81] : memref<144x512xbf16, #tpu.memory_space<vmem>>, vector<16x256xbf16>
    tpu.vector_store %arg8[%c128_80, %c0_81], %145 {strides = array<i32>} : memref<144x512xbf16, #tpu.memory_space<vmem>>, vector<16x256xbf16>,
    %147 = vector.extract_strided_slice %103 {offsets = [0, 256], sizes = [16, 256], strides = [1, 1]} : vector<16x512xf32> to vector<16x256xf32>
    %c17_i32_82 = arith.constant 17 : i32
    %148 = tpu.dynamic_rotate %147 by %c17_i32_82 dim 1 : vector<16x256xf32>, i32 -> vector<16x256xf32>
    %149 = vector.broadcast %0 : vector<1x256xf32> to vector<16x256xf32>
    %150 = arith.mulf %148, %149 : vector<16x256xf32>
    %151 = arith.truncf %150 : vector<16x256xf32> to vector<16x256xbf16>
    %c0_83 = arith.constant 0 : index
    %c256_84 = arith.constant 256 : index
    %152 = vector.load %arg8[%c0_83, %c256_84] : memref<144x512xbf16, #tpu.memory_space<vmem>>, vector<16x256xbf16>
    tpu.vector_store %arg8[%c0_83, %c256_84], %151 {strides = array<i32>} : memref<144x512xbf16, #tpu.memory_space<vmem>>, vector<16x256xbf16>,
    %c16_i32_85 = arith.constant 16 : i32
    %153 = tpu.dynamic_rotate %147 by %c16_i32_85 dim 1 : vector<16x256xf32>, i32 -> vector<16x256xf32>
    %154 = vector.broadcast %1 : vector<1x256xf32> to vector<16x256xf32>
    %155 = arith.mulf %153, %154 : vector<16x256xf32>
    %156 = arith.truncf %155 : vector<16x256xf32> to vector<16x256xbf16>
    %c16_86 = arith.constant 16 : index
    %c256_87 = arith.constant 256 : index
    %157 = vector.load %arg8[%c16_86, %c256_87] : memref<144x512xbf16, #tpu.memory_space<vmem>>, vector<16x256xbf16>
    tpu.vector_store %arg8[%c16_86, %c256_87], %156 {strides = array<i32>} : memref<144x512xbf16, #tpu.memory_space<vmem>>, vector<16x256xbf16>,
    %c15_i32_88 = arith.constant 15 : i32
    %158 = tpu.dynamic_rotate %147 by %c15_i32_88 dim 1 : vector<16x256xf32>, i32 -> vector<16x256xf32>
    %159 = vector.broadcast %2 : vector<1x256xf32> to vector<16x256xf32>
    %160 = arith.mulf %158, %159 : vector<16x256xf32>
    %161 = arith.truncf %160 : vector<16x256xf32> to vector<16x256xbf16>
    %c32_89 = arith.constant 32 : index
    %c256_90 = arith.constant 256 : index
    %162 = vector.load %arg8[%c32_89, %c256_90] : memref<144x512xbf16, #tpu.memory_space<vmem>>, vector<16x256xbf16>
    tpu.vector_store %arg8[%c32_89, %c256_90], %161 {strides = array<i32>} : memref<144x512xbf16, #tpu.memory_space<vmem>>, vector<16x256xbf16>,
    %c1_i32_91 = arith.constant 1 : i32
    %163 = tpu.dynamic_rotate %147 by %c1_i32_91 dim 1 : vector<16x256xf32>, i32 -> vector<16x256xf32>
    %164 = vector.broadcast %3 : vector<1x256xf32> to vector<16x256xf32>
    %165 = arith.mulf %163, %164 : vector<16x256xf32>
    %166 = arith.truncf %165 : vector<16x256xf32> to vector<16x256xbf16>
    %c48_92 = arith.constant 48 : index
    %c256_93 = arith.constant 256 : index
    %167 = vector.load %arg8[%c48_92, %c256_93] : memref<144x512xbf16, #tpu.memory_space<vmem>>, vector<16x256xbf16>
    tpu.vector_store %arg8[%c48_92, %c256_93], %166 {strides = array<i32>} : memref<144x512xbf16, #tpu.memory_space<vmem>>, vector<16x256xbf16>,
    %168 = arith.truncf %147 : vector<16x256xf32> to vector<16x256xbf16>
    %c64_94 = arith.constant 64 : index
    %c256_95 = arith.constant 256 : index
    %169 = vector.load %arg8[%c64_94, %c256_95] : memref<144x512xbf16, #tpu.memory_space<vmem>>, vector<16x256xbf16>
    tpu.vector_store %arg8[%c64_94, %c256_95], %168 {strides = array<i32>} : memref<144x512xbf16, #tpu.memory_space<vmem>>, vector<16x256xbf16>,
    %c255_i32_96 = arith.constant 255 : i32
    %170 = tpu.dynamic_rotate %147 by %c255_i32_96 dim 1 : vector<16x256xf32>, i32 -> vector<16x256xf32>
    %171 = vector.broadcast %4 : vector<1x256xf32> to vector<16x256xf32>
    %172 = arith.mulf %170, %171 : vector<16x256xf32>
    %173 = arith.truncf %172 : vector<16x256xf32> to vector<16x256xbf16>
    %c80_97 = arith.constant 80 : index
    %c256_98 = arith.constant 256 : index
    %174 = vector.load %arg8[%c80_97, %c256_98] : memref<144x512xbf16, #tpu.memory_space<vmem>>, vector<16x256xbf16>
    tpu.vector_store %arg8[%c80_97, %c256_98], %173 {strides = array<i32>} : memref<144x512xbf16, #tpu.memory_space<vmem>>, vector<16x256xbf16>,
    %c241_i32_99 = arith.constant 241 : i32
    %175 = tpu.dynamic_rotate %147 by %c241_i32_99 dim 1 : vector<16x256xf32>, i32 -> vector<16x256xf32>
    %176 = vector.broadcast %5 : vector<1x256xf32> to vector<16x256xf32>
    %177 = arith.mulf %175, %176 : vector<16x256xf32>
    %178 = arith.truncf %177 : vector<16x256xf32> to vector<16x256xbf16>
    %c96_100 = arith.constant 96 : index
    %c256_101 = arith.constant 256 : index
    %179 = vector.load %arg8[%c96_100, %c256_101] : memref<144x512xbf16, #tpu.memory_space<vmem>>, vector<16x256xbf16>
    tpu.vector_store %arg8[%c96_100, %c256_101], %178 {strides = array<i32>} : memref<144x512xbf16, #tpu.memory_space<vmem>>, vector<16x256xbf16>,
    %c240_i32_102 = arith.constant 240 : i32
    %180 = tpu.dynamic_rotate %147 by %c240_i32_102 dim 1 : vector<16x256xf32>, i32 -> vector<16x256xf32>
    %181 = vector.broadcast %6 : vector<1x256xf32> to vector<16x256xf32>
    %182 = arith.mulf %180, %181 : vector<16x256xf32>
    %183 = arith.truncf %182 : vector<16x256xf32> to vector<16x256xbf16>
    %c112_103 = arith.constant 112 : index
    %c256_104 = arith.constant 256 : index
    %184 = vector.load %arg8[%c112_103, %c256_104] : memref<144x512xbf16, #tpu.memory_space<vmem>>, vector<16x256xbf16>
    tpu.vector_store %arg8[%c112_103, %c256_104], %183 {strides = array<i32>} : memref<144x512xbf16, #tpu.memory_space<vmem>>, vector<16x256xbf16>,
    %c239_i32_105 = arith.constant 239 : i32
    %185 = tpu.dynamic_rotate %147 by %c239_i32_105 dim 1 : vector<16x256xf32>, i32 -> vector<16x256xf32>
    %186 = vector.broadcast %7 : vector<1x256xf32> to vector<16x256xf32>
    %187 = arith.mulf %185, %186 : vector<16x256xf32>
    %188 = arith.truncf %187 : vector<16x256xf32> to vector<16x256xbf16>
    %c128_106 = arith.constant 128 : index
    %c256_107 = arith.constant 256 : index
    %189 = vector.load %arg8[%c128_106, %c256_107] : memref<144x512xbf16, #tpu.memory_space<vmem>>, vector<16x256xbf16>
    tpu.vector_store %arg8[%c128_106, %c256_107], %188 {strides = array<i32>} : memref<144x512xbf16, #tpu.memory_space<vmem>>, vector<16x256xbf16>,
    %c0_108 = arith.constant 0 : index
    %c0_109 = arith.constant 0 : index
    %190 = vector.load %arg4[%c0_108, %c0_109] : memref<16x144xbf16, #tpu.memory_space<vmem>>, vector<16x144xbf16>
    %c0_110 = arith.constant 0 : index
    %c0_111 = arith.constant 0 : index
    %191 = vector.load %arg8[%c0_110, %c0_111] : memref<144x512xbf16, #tpu.memory_space<vmem>>, vector<144x512xbf16>
    %cst_112 = arith.constant dense<0.000000e+00> : vector<16x512xf32>
    %192 = tpu.matmul %190, %191, %cst_112 {dimension_numbers = #tpu.dot_dimension_numbers<[1], [0], [0], [1], [0, 0, 1, 1], [], []>} : vector<16x144xbf16>, vector<144x512xbf16>, vector<16x512xf32> -> vector<16x512xf32>
    %193 = vector.extract_strided_slice %192 {offsets = [0, 0], sizes = [16, 256], strides = [1, 1]} : vector<16x512xf32> to vector<16x256xf32>
    %c0_113 = arith.constant 0 : index
    %c0_114 = arith.constant 0 : index
    %194 = vector.load %arg5[%c0_113, %c0_114] : memref<16x1xf32, #tpu.memory_space<vmem>>, vector<16x1xf32>
    %195 = vector.broadcast %194 : vector<16x1xf32> to vector<16x256xf32>
    %196 = arith.addf %193, %195 : vector<16x256xf32>
    %c0_115 = arith.constant 0 : index
    %c0_116 = arith.constant 0 : index
    %c0_117 = arith.constant 0 : index
    %197 = vector.load %arg1[%c0_115, %c0_116, %c0_117] : memref<2x16x256xf32, #tpu.memory_space<vmem>>, vector<1x16x256xf32>
    %198 = vector.shape_cast %197 : vector<1x16x256xf32> to vector<16x256xf32>
    %199 = arith.addf %196, %198 : vector<16x256xf32>
    %cst_118 = arith.constant 0.000000e+00 : f32
    %200 = vector.broadcast %cst_118 : f32 to vector<16x256xf32>
    %201 = arith.maximumf %199, %200 : vector<16x256xf32>
    %c0_119 = arith.constant 0 : index
    %c0_120 = arith.constant 0 : index
    %c0_121 = arith.constant 0 : index
    %202 = vector.load %arg7[%c0_119, %c0_120, %c0_121] : memref<2x16x256xf32, #tpu.memory_space<vmem>>, vector<1x16x256xf32>
    %203 = vector.shape_cast %202 : vector<1x16x256xf32> to vector<16x256xf32>
    %204 = vector.shape_cast %201 : vector<16x256xf32> to vector<1x16x256xf32>
    tpu.vector_store %arg7[%c0_119, %c0_120, %c0_121], %204 {strides = array<i32>} : memref<2x16x256xf32, #tpu.memory_space<vmem>>, vector<1x16x256xf32>,
    %205 = vector.extract_strided_slice %192 {offsets = [0, 256], sizes = [16, 256], strides = [1, 1]} : vector<16x512xf32> to vector<16x256xf32>
    %c0_122 = arith.constant 0 : index
    %c0_123 = arith.constant 0 : index
    %206 = vector.load %arg5[%c0_122, %c0_123] : memref<16x1xf32, #tpu.memory_space<vmem>>, vector<16x1xf32>
    %207 = vector.broadcast %206 : vector<16x1xf32> to vector<16x256xf32>
    %208 = arith.addf %205, %207 : vector<16x256xf32>
    %c1_124 = arith.constant 1 : index
    %c0_125 = arith.constant 0 : index
    %c0_126 = arith.constant 0 : index
    %209 = vector.load %arg1[%c1_124, %c0_125, %c0_126] : memref<2x16x256xf32, #tpu.memory_space<vmem>>, vector<1x16x256xf32>
    %210 = vector.shape_cast %209 : vector<1x16x256xf32> to vector<16x256xf32>
    %211 = arith.addf %208, %210 : vector<16x256xf32>
    %cst_127 = arith.constant 0.000000e+00 : f32
    %212 = vector.broadcast %cst_127 : f32 to vector<16x256xf32>
    %213 = arith.maximumf %211, %212 : vector<16x256xf32>
    %c1_128 = arith.constant 1 : index
    %c0_129 = arith.constant 0 : index
    %c0_130 = arith.constant 0 : index
    %214 = vector.load %arg7[%c1_128, %c0_129, %c0_130] : memref<2x16x256xf32, #tpu.memory_space<vmem>>, vector<1x16x256xf32>
    %215 = vector.shape_cast %214 : vector<1x16x256xf32> to vector<16x256xf32>
    %216 = vector.shape_cast %213 : vector<16x256xf32> to vector<1x16x256xf32>
    tpu.vector_store %arg7[%c1_128, %c0_129, %c0_130], %216 {strides = array<i32>} : memref<2x16x256xf32, #tpu.memory_space<vmem>>, vector<1x16x256xf32>,
    return
  }
  func.func @transform_0(%arg0: i32) -> (i32, i32, i32) {
    %c0_i32 = arith.constant 0 : i32
    %c0_i32_0 = arith.constant 0 : i32
    %c0_i32_1 = arith.constant 0 : i32
    return %arg0, %c0_i32, %c0_i32_0 : i32, i32, i32
  }
  func.func @transform_1(%arg0: i32) -> (i32, i32) {
    %c0_i32 = arith.constant 0 : i32
    %c0_i32_0 = arith.constant 0 : i32
    %c0_i32_1 = arith.constant 0 : i32
    return %c0_i32, %c0_i32_0 : i32, i32
  }
  func.func @transform_2(%arg0: i32) -> (i32, i32) {
    %c0_i32 = arith.constant 0 : i32
    %c0_i32_0 = arith.constant 0 : i32
    %c0_i32_1 = arith.constant 0 : i32
    return %c0_i32, %c0_i32_0 : i32, i32
  }
  func.func @transform_3(%arg0: i32) -> (i32, i32) {
    %c0_i32 = arith.constant 0 : i32
    %c0_i32_0 = arith.constant 0 : i32
    %c0_i32_1 = arith.constant 0 : i32
    return %c0_i32, %c0_i32_0 : i32, i32
  }
  func.func @transform_4(%arg0: i32) -> (i32, i32) {
    %c0_i32 = arith.constant 0 : i32
    %c0_i32_0 = arith.constant 0 : i32
    %c0_i32_1 = arith.constant 0 : i32
    return %c0_i32, %c0_i32_0 : i32, i32
  }
  func.func @transform_5(%arg0: i32) -> (i32, i32) {
    %c0_i32 = arith.constant 0 : i32
    %c0_i32_0 = arith.constant 0 : i32
    %c0_i32_1 = arith.constant 0 : i32
    return %c0_i32, %c0_i32_0 : i32, i32
  }
  func.func @transform_6(%arg0: i32) -> (i32, i32, i32) {
    %c0_i32 = arith.constant 0 : i32
    %c0_i32_0 = arith.constant 0 : i32
    %c0_i32_1 = arith.constant 0 : i32
    return %arg0, %c0_i32, %c0_i32_0 : i32, i32, i32
  }
}

</mosaic_0001>

<bundles_post_ra>
// kernel: tpu_custom_call.1
= control target key start
LH: loop header
LB: loop body
LE: loop exit
PB: predicated region body
PF: predicated region fallthrough
CT: control target
= control target key end

     0   :  { %11 = vsyncpa [#allocation4], 0  ;;  %s2319_s0 = inlined_call_operand.hbm [shape: f32[2,16,256], index: 0, kind: input, shape index: {}]   ;;  %s2320_s1 = inlined_call_operand.vmem [shape: bf16[16,144], index: 1, kind: input, shape index: {}]   ;;  %s2321_s2 = inlined_call_operand.vmem [shape: f32[16,1], index: 2, kind: input, shape index: {}]   ;;  %s2322_s3 = inlined_call_operand.hbm [shape: bf16[16,144], index: 3, kind: input, shape index: {}]   ;;  %s2323_s4 = inlined_call_operand.vmem [shape: f32[16,1], index: 4, kind: input, shape index: {}]   ;;  %s2324_s5 = inlined_call_operand.vmem [shape: f32[9,256], index: 5, kind: input, shape index: {}]   ;;  %s2325_s6 = inlined_call_operand.hbm [shape: f32[2,16,256], index: 6, kind: output, shape index: {}]  }
   0x1   :  { %12 = vsyncpa [#allocation7], 0 }
   0x2   :  { %13 = vsyncpa [#allocation5], 0  ;;  %s1317_s21 = smov [#allocation3]   ;;  %s1245_s25 = scalar_lea.hbm %s2319_s0, 1024 }
   0x3   :  { %s19_s22 = sshll.u32 %s1317_s21, 4  ;;  %p1246_p0 = scmp.ne.s32.totalorder %s2319_s0, %s1245_s25  ;;  %s20_s22 = int_to_ptr.vmem [resolvable:$true] %s19_s22 }
   0x4   :  { %p1249_p1 = scmp.lt.u32.totalorder %s1245_s25, %s2319_s0 }
   0x6   :  { %p1251_p2 = pnand %p1249_p1, %p1246_p0 }
   0x8   :  { %1254 = shalt.err (!%p1251_p2)
}
   0x9   :  { %s1255_s30 = scalar_lea.vmem %s20_s22, 1024  ;;  %p1260_p4 = scmp.lt.s32.totalorder %s20_s22, %s20_s22 }
   0xa   :  { %p1256_p3 = scmp.ne.s32.totalorder %s20_s22, %s1255_s30  ;;  %p1261_p5 = scmp.lt.s32.totalorder %s1255_s30, %s1255_s30 }
   0xc   :  { %p1262_p6 = por %p1261_p5, %p1260_p4 }
   0xe   :  { %p1263_p7 = pnand %p1262_p6, %p1256_p3 }
  0x10   :  { %1266 = shalt.err (!%p1263_p7)
}
  0x11   :  { %s1318_s7 = smov 256   ;;  %s1319_s8 = smov 16  }
  0x12   :  { %25 = dma.hbm_to_vmem [thread:$0]  %s2319_s0, 1024, %s20_s22, [#allocation4], %s1318_s7, %s1318_s7, %s1319_s8  }
  0x13   :  { %s1320_s11 = smov [#allocation6]   ;;  %s1267_s15 = scalar_lea.hbm %s2322_s3, 256 }
  0x14   :  { %s35_s12 = sshll.u32 %s1320_s11, 4  ;;  %p1268_p8 = scmp.ne.s32.totalorder %s2322_s3, %s1267_s15  ;;  %s36_s12 = int_to_ptr.vmem [resolvable:$true] %s35_s12 }
  0x15   :  { %p1271_p9 = scmp.lt.u32.totalorder %s1267_s15, %s2322_s3 }
  0x17   :  { %p1273_p10 = pnand %p1271_p9, %p1268_p8 }
  0x19   :  { %1276 = shalt.err (!%p1273_p10)
}
  0x1a   :  { %s1277_s20 = scalar_lea.vmem %s36_s12, 256  ;;  %p1282_p12 = scmp.lt.s32.totalorder %s36_s12, %s36_s12 }
  0x1b   :  { %p1278_p11 = scmp.ne.s32.totalorder %s36_s12, %s1277_s20  ;;  %p1283_p13 = scmp.lt.s32.totalorder %s1277_s20, %s1277_s20 }
  0x1d   :  { %p1284_p0 = por %p1283_p13, %p1282_p12 }
  0x1f   :  { %p1285_p1 = pnand %p1284_p0, %p1278_p11 }
  0x21   :  { %1288 = shalt.err (!%p1285_p1)
}
  0x22   :  { %s1321_s0 = smov 128   ;;  %s1322_s21 = smov 8  }
  0x23   :  { %41 = dma.hbm_to_vmem [thread:$0]  %s2322_s3, 256, %s36_s12, [#allocation7], %s1321_s0, %s1321_s0, %s1322_s21  }
  0x24   :  { %1311 = dma.done.wait [#allocation4], 1024  }
  0x25   :  { %1312 = vsyncadd [#allocation4], 4294966272 }
  0x26   :  { %1313 = dma.done.wait [#allocation7], 256  }
  0x27   :  { %1314 = vsyncadd [#allocation7], 4294967040  ;;  %v1394_v0 = vld [vmem:[#allocation3 + $0x8] sm:$0xff]  ;;  %v1396_v1 = vld [vmem:[#allocation3] sm:$0xff]  ;;  %s1323_s24 = smov 17   ;;  %s1324_s3 = smov 15   ;;  %v80_v8 = vlaneseq }
  0x28   :  { %76 = vrot.lane.b32.xlu1 %v1394_v0, %s1323_s24  ;;  %72 = vrot.lane.b32.xlu0 %v1396_v1, %s1323_s24  ;;  %v1402_v2 = vld [vmem:[#allocation3 + $0x18] sm:$0xff]  ;;  %v1404_v3 = vld [vmem:[#allocation3 + $0x10] sm:$0xff]  ;;  %v1412_v5 = vld [vmem:[#allocation3 + $0x20] sm:$0xff]  ;;  %s1325_s25 = smov 1   ;;  %s1326_s26 = smov 127   ;;  %vm562_vm0 = vcmask 130048  }
  0x29   :  { %v1410_v4 = vld [vmem:[#allocation3 + $0x30] sm:$0xff]  ;;  %v1418_v6 = vld [vmem:[#allocation3 + $0x38] sm:$0xff]  ;;  %v1420_v7 = vld [vmem:[#allocation3 + $0x28] sm:$0xff]  ;;  %s1327_s27 = smov 113   ;;  %s1328_s28 = smov 112   ;;  %v89_v9 = vshrl.u32 %v80_v8, 7 }
  0x2a   :  { %v1522_v10 = vand.u32 127, %v80_v8  ;;  %v1241_v12 = vld [vmem:[%s2320_s1 + $0x4] ss:$8 sps:$4 sm:$0xff]   ;;  %s1329_s9 = smov 111   ;;  %v1330_v29 = vmov 0  }
  0x2b   :  { %v1524_v11 = vsub.s32 1, %v89_v9  ;;  %v53_v13 = vld [vmem:[%s2324_s5] ss:$8 sm:$0x3]  ;;  %v1536_v14 = vsub.s32 0, %v89_v9  ;;  %1216 = vmatprep.mubr.msk.bf16.mxu0 %vm562_vm0, %v1241_v12  ;;  %1217 = vmatprep.mubr.msk.bf16.mxu1 %vm562_vm0, %v1241_v12 }
  0x2c   :  { %78 = vrot.lane.b32.xlu1 %v1402_v2, %s1323_s24  ;;  %74 = vrot.lane.b32.xlu0 %v1404_v3, %s1323_s24  ;;  %vm82_vm1 = vcmp.lt.s32.totalorder %v1522_v10, 17  ;;  %v542_v34 = vld [vmem:[%s2321_s2 + $0x8] sm:$0xff]  ;;  %v541_v37 = vld [vmem:[%s2321_s2] sm:$0xff]  ;;  %vm114_vm2 = vcmp.lt.s32.totalorder %v1522_v10, 16  ;;  %vm146_vm3 = vcmp.lt.s32.totalorder %v1522_v10, 15  ;;  %vm178_vm4 = vcmp.lt.s32.totalorder %v1522_v10, 1 }
  0x2d   :  { %v1542_v17 = vrot.slane %v53_v13, %v1524_v11  ;;  %v1551_v19 = vrot.slane %v53_v13, %v1536_v14  ;;  %1238 = vset.pattern.permute.xlu1 %v1330_v29  ;;  %1237 = vset.pattern.permute.xlu0 %v1330_v29  ;;  %v1207_v46 = vld [vmem:[%s2324_s5 + $0x1] ss:$8 sm:$0x3]  ;;  %vm214_vm5 = vcmp.lt.s32.totalorder %v1522_v10, 127  ;;  %vm246_vm6 = vcmp.lt.s32.totalorder %v1522_v10, 113 }
  0x2e   :  { %v1594_v51 = vrot.slane %v1207_v46, %v1536_v14  ;;  %v1597_v52 = vrot.slane %v1207_v46, %v1524_v11  ;;  %vm278_vm7 = vcmp.lt.s32.totalorder %v1522_v10, 112  ;;  %vm310_vm8 = vcmp.lt.s32.totalorder %v1522_v10, 111 }
  0x30   :  { %341 = vrot.lane.b32.xlu1 %v1410_v4, %s1323_s24  ;;  %339 = vrot.lane.b32.xlu0 %v1412_v5, %s1323_s24 }
  0x34   :  { %345 = vrot.lane.b32.xlu1 %v1418_v6, %s1323_s24  ;;  %343 = vrot.lane.b32.xlu0 %v1420_v7, %s1323_s24 }
  0x38   :  { %108 = vrot.lane.b32.xlu1 %v1404_v3, %s1319_s8  ;;  %106 = vrot.lane.b32.xlu0 %v1396_v1, %s1319_s8 }
  0x3c   :  { %112 = vrot.lane.b32.xlu1 %v1402_v2, %s1319_s8  ;;  %110 = vrot.lane.b32.xlu0 %v1394_v0, %s1319_s8 }
  0x40   :  { %361 = vrot.lane.b32.xlu1 %v1410_v4, %s1319_s8  ;;  %359 = vrot.lane.b32.xlu0 %v1412_v5, %s1319_s8 }
  0x44   :  { %365 = vrot.lane.b32.xlu1 %v1418_v6, %s1319_s8  ;;  %363 = vrot.lane.b32.xlu0 %v1420_v7, %s1319_s8 }
  0x48   :  { %140 = vrot.lane.b32.xlu1 %v1404_v3, %s1324_s3  ;;  %138 = vrot.lane.b32.xlu0 %v1396_v1, %s1324_s3 }
  0x4c   :  { %144 = vrot.lane.b32.xlu1 %v1402_v2, %s1324_s3  ;;  %142 = vrot.lane.b32.xlu0 %v1394_v0, %s1324_s3 }
  0x50   :  { %381 = vrot.lane.b32.xlu1 %v1410_v4, %s1324_s3  ;;  %379 = vrot.lane.b32.xlu0 %v1412_v5, %s1324_s3 }
  0x54   :  { %385 = vrot.lane.b32.xlu1 %v1418_v6, %s1324_s3  ;;  %383 = vrot.lane.b32.xlu0 %v1420_v7, %s1324_s3 }
  0x58   :  { %172 = vrot.lane.b32.xlu1 %v1404_v3, %s1325_s25  ;;  %170 = vrot.lane.b32.xlu0 %v1396_v1, %s1325_s25 }
  0x5c   :  { %176 = vrot.lane.b32.xlu1 %v1402_v2, %s1325_s25  ;;  %174 = vrot.lane.b32.xlu0 %v1394_v0, %s1325_s25 }
  0x60   :  { %401 = vrot.lane.b32.xlu1 %v1410_v4, %s1325_s25  ;;  %399 = vrot.lane.b32.xlu0 %v1412_v5, %s1325_s25 }
  0x64   :  { %405 = vrot.lane.b32.xlu1 %v1418_v6, %s1325_s25  ;;  %403 = vrot.lane.b32.xlu0 %v1420_v7, %s1325_s25 }
  0x68   :  { %208 = vrot.lane.b32.xlu1 %v1404_v3, %s1326_s26  ;;  %206 = vrot.lane.b32.xlu0 %v1396_v1, %s1326_s26 }
  0x6c   :  { %212 = vrot.lane.b32.xlu1 %v1402_v2, %s1326_s26  ;;  %210 = vrot.lane.b32.xlu0 %v1394_v0, %s1326_s26 }
  0x70   :  { %425 = vrot.lane.b32.xlu1 %v1410_v4, %s1326_s26  ;;  %423 = vrot.lane.b32.xlu0 %v1412_v5, %s1326_s26 }
  0x74   :  { %429 = vrot.lane.b32.xlu1 %v1418_v6, %s1326_s26  ;;  %427 = vrot.lane.b32.xlu0 %v1420_v7, %s1326_s26 }
  0x78   :  { %240 = vrot.lane.b32.xlu1 %v1404_v3, %s1327_s27  ;;  %238 = vrot.lane.b32.xlu0 %v1396_v1, %s1327_s27 }
  0x7c   :  { %244 = vrot.lane.b32.xlu1 %v1402_v2, %s1327_s27  ;;  %242 = vrot.lane.b32.xlu0 %v1394_v0, %s1327_s27 }
  0x80   :  { %445 = vrot.lane.b32.xlu1 %v1410_v4, %s1327_s27  ;;  %443 = vrot.lane.b32.xlu0 %v1412_v5, %s1327_s27 }
  0x84   :  { %449 = vrot.lane.b32.xlu1 %v1418_v6, %s1327_s27  ;;  %447 = vrot.lane.b32.xlu0 %v1420_v7, %s1327_s27 }
  0x88   :  { %272 = vrot.lane.b32.xlu1 %v1404_v3, %s1328_s28  ;;  %270 = vrot.lane.b32.xlu0 %v1396_v1, %s1328_s28 }
  0x8c   :  { %276 = vrot.lane.b32.xlu1 %v1402_v2, %s1328_s28  ;;  %274 = vrot.lane.b32.xlu0 %v1394_v0, %s1328_s28 }
  0x90   :  { %465 = vrot.lane.b32.xlu1 %v1410_v4, %s1328_s28  ;;  %463 = vrot.lane.b32.xlu0 %v1412_v5, %s1328_s28 }
  0x94   :  { %469 = vrot.lane.b32.xlu1 %v1418_v6, %s1328_s28  ;;  %467 = vrot.lane.b32.xlu0 %v1420_v7, %s1328_s28 }
  0x98   :  { %304 = vrot.lane.b32.xlu1 %v1404_v3, %s1329_s9  ;;  %302 = vrot.lane.b32.xlu0 %v1396_v1, %s1329_s9 }
  0x9a   :  { %v77_v15 = vpop.permute.xlu1 %76  ;;  %v73_v16 = vpop.permute.xlu0 %72 }
  0x9b   :  { %v83_v18 = vsel %vm82_vm1, %v73_v16, %v77_v15  ;;  %v85_v20 = vsel %vm82_vm1, %v77_v15, %v73_v16 }
  0x9c   :  { %308 = vrot.lane.b32.xlu1 %v1402_v2, %s1329_s9  ;;  %306 = vrot.lane.b32.xlu0 %v1394_v0, %s1329_s9  ;;  %v99_v25 = vmul.f32 %v1542_v17, %v83_v18  ;;  %v98_v27 = vmul.f32 %v1551_v19, %v85_v20 }
  0x9e   :  { %v79_v21 = vpop.permute.xlu1 %78  ;;  %v75_v22 = vpop.permute.xlu0 %74 }
  0x9f   :  { %v86_v23 = vsel %vm82_vm1, %v79_v21, %v75_v22  ;;  %v84_v24 = vsel %vm82_vm1, %v75_v22, %v79_v21 }
  0xa0   :  { %485 = vrot.lane.b32.xlu1 %v1410_v4, %s1329_s9  ;;  %483 = vrot.lane.b32.xlu0 %v1412_v5, %s1329_s9  ;;  %v101_v26 = vmul.f32 %v1542_v17, %v84_v24  ;;  %v100_v28 = vmul.f32 %v1551_v19, %v86_v23 }
  0xa2   :  { %v342_v30 = vpop.permute.xlu1 %341  ;;  %v340_v31 = vpop.permute.xlu0 %339  ;;  %v103_v32 = vpack.c.bf16 %v101_v26, %v99_v25  ;;  %v102_v33 = vpack.c.bf16 %v100_v28, %v98_v27  ;;  %v1208_v26 = vld [vmem:[%s2324_s5 + $0x2] ss:$8 sm:$0x3] }
  0xa4   :  { %489 = vrot.lane.b32.xlu1 %v1418_v6, %s1329_s9  ;;  %487 = vrot.lane.b32.xlu0 %v1420_v7, %s1329_s9 }
  0xa5   :  { %566 = vmatprep.subr.bf16.mxu0 %v103_v32  ;;  %v1631_v32 = vrot.slane %v1208_v26, %v1524_v11 }
  0xa6   :  { %567 = vmatpush1.bf16.msra.mxu0 %v102_v33  ;;  %v346_v35 = vpop.permute.xlu1 %345  ;;  %v344_v36 = vpop.permute.xlu0 %343 }
  0xa7   :  { %v350_v38 = vsel %vm82_vm1, %v346_v35, %v342_v30  ;;  %v349_v39 = vsel %vm82_vm1, %v344_v36, %v340_v31  ;;  %v347_v40 = vsel %vm82_vm1, %v340_v31, %v344_v36  ;;  %v348_v41 = vsel %vm82_vm1, %v342_v30, %v346_v35 }
  0xa8   :  { %v352_v42 = vmul.f32 %v347_v40, %v1542_v17  ;;  %v354_v43 = vmul.f32 %v348_v41, %v1542_v17  ;;  %v351_v44 = vmul.f32 %v349_v39, %v1551_v19  ;;  %v353_v45 = vmul.f32 %v350_v38, %v1551_v19  ;;  %550 = vperm.xlu1 %1238, %v542_v34  }
  0xa9   :  { %545 = vperm.xlu0 %1237, %v541_v37   ;;  %v1628_v31 = vrot.slane %v1208_v26, %v1536_v14 }
  0xaa   :  { %v109_v47 = vpop.permute.xlu1 %108  ;;  %v107_v48 = vpop.permute.xlu0 %106  ;;  %v356_v49 = vpack.c.bf16 %v354_v43, %v352_v42  ;;  %v355_v50 = vpack.c.bf16 %v353_v45, %v351_v44 }
  0xac   :  { %609 = vmatprep.subr.bf16.mxu1 %v356_v49 }
  0xad   :  { %610 = vmatpush1.bf16.msra.mxu1 %v355_v50 }
  0xae   :  { %v113_v53 = vpop.permute.xlu1 %112  ;;  %v111_v54 = vpop.permute.xlu0 %110 }
  0xaf   :  { %v116_v55 = vsel %vm114_vm2, %v109_v47, %v113_v53  ;;  %v118_v56 = vsel %vm114_vm2, %v113_v53, %v109_v47  ;;  %v115_v57 = vsel %vm114_vm2, %v107_v48, %v111_v54  ;;  %v117_v58 = vsel %vm114_vm2, %v111_v54, %v107_v48 }
  0xb0   :  { %v132_v59 = vmul.f32 %v1594_v51, %v118_v56  ;;  %v133_v60 = vmul.f32 %v1597_v52, %v116_v55  ;;  %v130_v61 = vmul.f32 %v1594_v51, %v117_v58  ;;  %v131_v62 = vmul.f32 %v1597_v52, %v115_v57 }
  0xb2   :  { %v362_v63 = vpop.permute.xlu1 %361  ;;  %v360_v8 = vpop.permute.xlu0 %359  ;;  %v135_v9 = vpack.c.bf16 %v133_v60, %v131_v62  ;;  %v134_v12 = vpack.c.bf16 %v132_v59, %v130_v61  ;;  %v1209_v59 = vld [vmem:[%s2324_s5 + $0x3] ss:$8 sm:$0x3] }
  0xb4   :  { %568 = vmatprep.subr.bf16.mxu0 %v135_v9  ;;  %v1665_v9 = vrot.slane %v1209_v59, %v1524_v11 }
  0xb5   :  { %569 = vmatpush1.bf16.msra.mxu0 %v134_v12 }
  0xb6   :  { %v366_v13 = vpop.permute.xlu1 %365  ;;  %v364_v15 = vpop.permute.xlu0 %363 }
  0xb7   :  { %v368_v16 = vsel %vm114_vm2, %v362_v63, %v366_v13  ;;  %v370_v18 = vsel %vm114_vm2, %v366_v13, %v362_v63  ;;  %v367_v20 = vsel %vm114_vm2, %v360_v8, %v364_v15  ;;  %v369_v21 = vsel %vm114_vm2, %v364_v15, %v360_v8 }
  0xb8   :  { %v373_v22 = vmul.f32 %v370_v18, %v1594_v51  ;;  %v374_v23 = vmul.f32 %v368_v16, %v1597_v52  ;;  %v371_v24 = vmul.f32 %v369_v21, %v1594_v51  ;;  %v372_v25 = vmul.f32 %v367_v20, %v1597_v52 }
  0xb9   :  { %v1662_v8 = vrot.slane %v1209_v59, %v1536_v14 }
  0xba   :  { %v141_v27 = vpop.permute.xlu1 %140  ;;  %v139_v28 = vpop.permute.xlu0 %138  ;;  %v376_v29 = vpack.c.bf16 %v374_v23, %v372_v25  ;;  %v375_v30 = vpack.c.bf16 %v373_v22, %v371_v24 }
  0xbc   :  { %611 = vmatprep.subr.bf16.mxu1 %v376_v29  ;;  %v203_v29 = vpack.c.bf16 %v1402_v2, %v1394_v0 }
  0xbd   :  { %612 = vmatpush1.bf16.msra.mxu1 %v375_v30  ;;  %v202_v30 = vpack.c.bf16 %v1404_v3, %v1396_v1 }
  0xbe   :  { %v145_v33 = vpop.permute.xlu1 %144  ;;  %v143_v34 = vpop.permute.xlu0 %142 }
  0xbf   :  { %v148_v35 = vsel %vm146_vm3, %v141_v27, %v145_v33  ;;  %v150_v36 = vsel %vm146_vm3, %v145_v33, %v141_v27  ;;  %v147_v37 = vsel %vm146_vm3, %v139_v28, %v143_v34  ;;  %v149_v38 = vsel %vm146_vm3, %v143_v34, %v139_v28 }
  0xc0   :  { %v164_v39 = vmul.f32 %v1628_v31, %v150_v36  ;;  %v165_v40 = vmul.f32 %v1631_v32, %v148_v35  ;;  %v162_v41 = vmul.f32 %v1628_v31, %v149_v38  ;;  %v163_v42 = vmul.f32 %v1631_v32, %v147_v37 }
  0xc2   :  { %v382_v43 = vpop.permute.xlu1 %381  ;;  %v380_v44 = vpop.permute.xlu0 %379  ;;  %v167_v45 = vpack.c.bf16 %v165_v40, %v163_v42  ;;  %v166_v46 = vpack.c.bf16 %v164_v39, %v162_v41  ;;  %v1210_v39 = vld [vmem:[%s2324_s5 + $0x5] ss:$8 sm:$0x3] }
  0xc4   :  { %570 = vmatprep.subr.bf16.mxu0 %v167_v45  ;;  %v1702_v45 = vrot.slane %v1210_v39, %v1536_v14 }
  0xc5   :  { %571 = vmatpush1.bf16.msra.mxu0 %v166_v46  ;;  %v1705_v46 = vrot.slane %v1210_v39, %v1524_v11 }
  0xc6   :  { %v386_v47 = vpop.permute.xlu1 %385  ;;  %v384_v48 = vpop.permute.xlu0 %383 }
  0xc7   :  { %v388_v49 = vsel %vm146_vm3, %v382_v43, %v386_v47  ;;  %v390_v50 = vsel %vm146_vm3, %v386_v47, %v382_v43  ;;  %v387_v53 = vsel %vm146_vm3, %v380_v44, %v384_v48  ;;  %v389_v54 = vsel %vm146_vm3, %v384_v48, %v380_v44 }
  0xc8   :  { %v393_v55 = vmul.f32 %v390_v50, %v1628_v31  ;;  %v394_v56 = vmul.f32 %v388_v49, %v1631_v32  ;;  %v391_v57 = vmul.f32 %v389_v54, %v1628_v31  ;;  %v392_v58 = vmul.f32 %v387_v53, %v1631_v32 }
  0xc9   :  { %v420_v44 = vpack.c.bf16 %v1418_v6, %v1420_v7  ;;  %v419_v47 = vpack.c.bf16 %v1410_v4, %v1412_v5 }
  0xca   :  { %v173_v60 = vpop.permute.xlu1 %172  ;;  %v171_v61 = vpop.permute.xlu0 %170  ;;  %v396_v62 = vpack.c.bf16 %v394_v56, %v392_v58  ;;  %v395_v63 = vpack.c.bf16 %v393_v55, %v391_v57 }
  0xcc   :  { %613 = vmatprep.subr.bf16.mxu1 %v396_v62 }
  0xcd   :  { %614 = vmatpush1.bf16.msra.mxu1 %v395_v63 }
  0xce   :  { %v177_v12 = vpop.permute.xlu1 %176  ;;  %v175_v13 = vpop.permute.xlu0 %174 }
  0xcf   :  { %v180_v15 = vsel %vm178_vm4, %v173_v60, %v177_v12  ;;  %v182_v16 = vsel %vm178_vm4, %v177_v12, %v173_v60  ;;  %v179_v18 = vsel %vm178_vm4, %v171_v61, %v175_v13  ;;  %v181_v20 = vsel %vm178_vm4, %v175_v13, %v171_v61 }
  0xd0   :  { %v196_v21 = vmul.f32 %v1662_v8, %v182_v16  ;;  %v197_v22 = vmul.f32 %v1665_v9, %v180_v15  ;;  %v194_v23 = vmul.f32 %v1662_v8, %v181_v20  ;;  %v195_v24 = vmul.f32 %v1665_v9, %v179_v18 }
  0xd2   :  { %v402_v25 = vpop.permute.xlu1 %401  ;;  %v400_v26 = vpop.permute.xlu0 %399  ;;  %v199_v27 = vpack.c.bf16 %v197_v22, %v195_v24  ;;  %v198_v28 = vpack.c.bf16 %v196_v21, %v194_v23  ;;  %v1211_v21 = vld [vmem:[%s2324_s5 + $0x6] ss:$8 sm:$0x3] }
  0xd4   :  { %572 = vmatprep.subr.bf16.mxu0 %v199_v27  ;;  %v1741_v27 = vrot.slane %v1211_v21, %v1524_v11 }
  0xd5   :  { %573 = vmatpush1.bf16.msra.mxu0 %v198_v28 }
  0xd6   :  { %v406_v33 = vpop.permute.xlu1 %405  ;;  %v404_v34 = vpop.permute.xlu0 %403  ;;  %574 = vmatprep.subr.bf16.mxu0 %v203_v29 }
  0xd7   :  { %v408_v35 = vsel %vm178_vm4, %v402_v25, %v406_v33  ;;  %v410_v36 = vsel %vm178_vm4, %v406_v33, %v402_v25  ;;  %v407_v37 = vsel %vm178_vm4, %v400_v26, %v404_v34  ;;  %v409_v0 = vsel %vm178_vm4, %v404_v34, %v400_v26 }
  0xd8   :  { %v413_v2 = vmul.f32 %v410_v36, %v1662_v8  ;;  %v414_v38 = vmul.f32 %v408_v35, %v1665_v9  ;;  %v411_v1 = vmul.f32 %v409_v0, %v1662_v8  ;;  %v412_v3 = vmul.f32 %v407_v37, %v1665_v9 }
  0xd9   :  { %575 = vmatpush1.bf16.msra.mxu0 %v202_v30  ;;  %v1738_v26 = vrot.slane %v1211_v21, %v1536_v14 }
  0xda   :  { %v209_v40 = vpop.permute.xlu1 %208  ;;  %v207_v41 = vpop.permute.xlu0 %206  ;;  %v416_v42 = vpack.c.bf16 %v414_v38, %v412_v3  ;;  %v415_v43 = vpack.c.bf16 %v413_v2, %v411_v1 }
  0xdc   :  { %615 = vmatprep.subr.bf16.mxu1 %v416_v42 }
  0xdd   :  { %616 = vmatpush1.bf16.msra.mxu1 %v415_v43 }
  0xde   :  { %v213_v48 = vpop.permute.xlu1 %212  ;;  %v211_v49 = vpop.permute.xlu0 %210  ;;  %617 = vmatprep.subr.bf16.mxu1 %v420_v44 }
  0xdf   :  { %v216_v50 = vsel %vm214_vm5, %v209_v40, %v213_v48  ;;  %v218_v6 = vsel %vm214_vm5, %v213_v48, %v209_v40  ;;  %v215_v7 = vsel %vm214_vm5, %v207_v41, %v211_v49  ;;  %v217_v53 = vsel %vm214_vm5, %v211_v49, %v207_v41 }
  0xe0   :  { %v232_v54 = vmul.f32 %v1702_v45, %v216_v50  ;;  %v233_v55 = vmul.f32 %v1705_v46, %v218_v6  ;;  %v230_v4 = vmul.f32 %v1702_v45, %v215_v7  ;;  %v231_v5 = vmul.f32 %v1705_v46, %v217_v53  ;;  %v1212_v7 = vld [vmem:[%s2324_s5 + $0x7] ss:$8 sm:$0x3] }
  0xe1   :  { %618 = vmatpush1.bf16.msra.mxu1 %v419_v47 }
  0xe2   :  { %v426_v56 = vpop.permute.xlu1 %425  ;;  %v424_v57 = vpop.permute.xlu0 %423  ;;  %v235_v58 = vpack.c.bf16 %v233_v55, %v231_v5  ;;  %v234_v59 = vpack.c.bf16 %v232_v54, %v230_v4  ;;  %v1772_v5 = vrot.slane %v1212_v7, %v1536_v14 }
  0xe4   :  { %576 = vmatprep.subr.bf16.mxu0 %v235_v58 }
  0xe5   :  { %577 = vmatpush1.bf16.msra.mxu0 %v234_v59 }
  0xe6   :  { %v430_v60 = vpop.permute.xlu1 %429  ;;  %v428_v61 = vpop.permute.xlu0 %427 }
  0xe7   :  { %v432_v62 = vsel %vm214_vm5, %v426_v56, %v430_v60  ;;  %v434_v63 = vsel %vm214_vm5, %v430_v60, %v426_v56  ;;  %v431_v12 = vsel %vm214_vm5, %v424_v57, %v428_v61  ;;  %v433_v13 = vsel %vm214_vm5, %v428_v61, %v424_v57 }
  0xe8   :  { %v437_v15 = vmul.f32 %v432_v62, %v1702_v45  ;;  %v438_v16 = vmul.f32 %v434_v63, %v1705_v46  ;;  %v435_v18 = vmul.f32 %v431_v12, %v1702_v45  ;;  %v436_v20 = vmul.f32 %v433_v13, %v1705_v46 }
  0xe9   :  { %v1775_v56 = vrot.slane %v1212_v7, %v1524_v11 }
  0xea   :  { %v241_v22 = vpop.permute.xlu1 %240  ;;  %v239_v23 = vpop.permute.xlu0 %238  ;;  %v440_v24 = vpack.c.bf16 %v438_v16, %v436_v20  ;;  %v439_v25 = vpack.c.bf16 %v437_v15, %v435_v18 }
  0xec   :  { %619 = vmatprep.subr.bf16.mxu1 %v440_v24 }
  0xed   :  { %620 = vmatpush1.bf16.msra.mxu1 %v439_v25 }
  0xee   :  { %v245_v28 = vpop.permute.xlu1 %244  ;;  %v243_v29 = vpop.permute.xlu0 %242 }
  0xef   :  { %v248_v30 = vsel %vm246_vm6, %v241_v22, %v245_v28  ;;  %v250_v33 = vsel %vm246_vm6, %v245_v28, %v241_v22  ;;  %v247_v34 = vsel %vm246_vm6, %v239_v23, %v243_v29  ;;  %v249_v35 = vsel %vm246_vm6, %v243_v29, %v239_v23 }
  0xf0   :  { %v264_v36 = vmul.f32 %v1738_v26, %v248_v30  ;;  %v265_v37 = vmul.f32 %v1741_v27, %v250_v33  ;;  %v262_v0 = vmul.f32 %v1738_v26, %v247_v34  ;;  %v263_v2 = vmul.f32 %v1741_v27, %v249_v35 }
  0xf2   :  { %v446_v38 = vpop.permute.xlu1 %445  ;;  %v444_v1 = vpop.permute.xlu0 %443  ;;  %v267_v3 = vpack.c.bf16 %v265_v37, %v263_v2  ;;  %v266_v39 = vpack.c.bf16 %v264_v36, %v262_v0  ;;  %v1213_v36 = vld [vmem:[%s2324_s5 + $0x10] ss:$8 sm:$0x3] }
  0xf4   :  { %578 = vmatprep.subr.bf16.mxu0 %v267_v3  ;;  %v1809_v3 = vrot.slane %v1213_v36, %v1524_v11 }
  0xf5   :  { %579 = vmatpush1.bf16.msra.mxu0 %v266_v39 }
  0xf6   :  { %v450_v40 = vpop.permute.xlu1 %449  ;;  %v448_v41 = vpop.permute.xlu0 %447  ;;  %2337 = vst [vmem:[#allocation13_spill] sm:$0xff] %v1809_v3 }
  0xf7   :  { %v452_v42 = vsel %vm246_vm6, %v446_v38, %v450_v40  ;;  %v454_v43 = vsel %vm246_vm6, %v450_v40, %v446_v38  ;;  %v451_v44 = vsel %vm246_vm6, %v444_v1, %v448_v41  ;;  %v453_v47 = vsel %vm246_vm6, %v448_v41, %v444_v1 }
  0xf8   :  { %v457_v48 = vmul.f32 %v452_v42, %v1738_v26  ;;  %v458_v49 = vmul.f32 %v454_v43, %v1741_v27  ;;  %v455_v50 = vmul.f32 %v451_v44, %v1738_v26  ;;  %v456_v6 = vmul.f32 %v453_v47, %v1741_v27 }
  0xf9   :  { %v1806_v1 = vrot.slane %v1213_v36, %v1536_v14 }
  0xfa   :  { %v273_v53 = vpop.permute.xlu1 %272  ;;  %v271_v54 = vpop.permute.xlu0 %270  ;;  %v460_v55 = vpack.c.bf16 %v458_v49, %v456_v6  ;;  %v459_v4 = vpack.c.bf16 %v457_v48, %v455_v50 }
  0xfb   :  { %2336 = vst [vmem:[#allocation12_spill] sm:$0xff] %v1806_v1 }
  0xfc   :  { %621 = vmatprep.subr.bf16.mxu1 %v460_v55 }
  0xfd   :  { %622 = vmatpush1.bf16.msra.mxu1 %v459_v4 }
  0xfe   :  { %v277_v57 = vpop.permute.xlu1 %276  ;;  %v275_v58 = vpop.permute.xlu0 %274 }
  0xff   :  { %v280_v59 = vsel %vm278_vm7, %v273_v53, %v277_v57  ;;  %v282_v60 = vsel %vm278_vm7, %v277_v57, %v273_v53  ;;  %v279_v61 = vsel %vm278_vm7, %v271_v54, %v275_v58  ;;  %v281_v62 = vsel %vm278_vm7, %v275_v58, %v271_v54  ;;  %v1239_v53 = vld [vmem:[%s2320_s1] ss:$8 sps:$4 sm:$0xff]  }
 0x100   :  { %v296_v63 = vmul.f32 %v1772_v5, %v280_v59  ;;  %v297_v12 = vmul.f32 %v1775_v56, %v282_v60  ;;  %v294_v13 = vmul.f32 %v1772_v5, %v279_v61  ;;  %v295_v15 = vmul.f32 %v1775_v56, %v281_v62 }
 0x102   :  { %v466_v16 = vpop.permute.xlu1 %465  ;;  %v464_v18 = vpop.permute.xlu0 %463  ;;  %v299_v20 = vpack.c.bf16 %v297_v12, %v295_v15  ;;  %v298_v21 = vpack.c.bf16 %v296_v63, %v294_v13 }
 0x104   :  { %580 = vmatprep.subr.bf16.mxu0 %v299_v20 }
 0x105   :  { %581 = vmatpush1.bf16.msra.mxu0 %v298_v21 }
 0x106   :  { %v470_v22 = vpop.permute.xlu1 %469  ;;  %v468_v23 = vpop.permute.xlu0 %467 }
 0x107   :  { %v472_v24 = vsel %vm278_vm7, %v466_v16, %v470_v22  ;;  %v474_v25 = vsel %vm278_vm7, %v470_v22, %v466_v16  ;;  %v471_v28 = vsel %vm278_vm7, %v464_v18, %v468_v23  ;;  %v473_v29 = vsel %vm278_vm7, %v468_v23, %v464_v18 }
 0x108   :  { %v477_v30 = vmul.f32 %v472_v24, %v1772_v5  ;;  %v478_v33 = vmul.f32 %v474_v25, %v1775_v56  ;;  %v475_v34 = vmul.f32 %v471_v28, %v1772_v5  ;;  %v476_v35 = vmul.f32 %v473_v29, %v1775_v56 }
 0x10a   :  { %v305_v37 = vpop.permute.xlu1 %304  ;;  %v303_v0 = vpop.permute.xlu0 %302  ;;  %v480_v2 = vpack.c.bf16 %v478_v33, %v476_v35  ;;  %v479_v38 = vpack.c.bf16 %v477_v30, %v475_v34 }
 0x10c   :  { %623 = vmatprep.subr.bf16.mxu1 %v480_v2 }
 0x10d   :  { %624 = vmatpush1.bf16.msra.mxu1 %v479_v38 }
 0x10e   :  { %v309_v39 = vpop.permute.xlu1 %308  ;;  %v307_v40 = vpop.permute.xlu0 %306 }
 0x10f   :  { %v312_v41 = vsel %vm310_vm8, %v305_v37, %v309_v39  ;;  %v314_v42 = vsel %vm310_vm8, %v309_v39, %v305_v37  ;;  %v311_v43 = vsel %vm310_vm8, %v303_v0, %v307_v40  ;;  %v313_v44 = vsel %vm310_vm8, %v307_v40, %v303_v0 }
 0x110   :  { %v328_v14 = vmul.f32 %v1806_v1, %v312_v41  ;;  %v329_v11 = vmul.f32 %v1809_v3, %v314_v42  ;;  %v326_v47 = vmul.f32 %v1806_v1, %v311_v43  ;;  %v327_v48 = vmul.f32 %v1809_v3, %v313_v44 }
 0x112   :  { %v486_v49 = vpop.permute.xlu1 %485  ;;  %v484_v50 = vpop.permute.xlu0 %483  ;;  %v331_v6 = vpack.c.bf16 %v329_v11, %v327_v48  ;;  %v330_v7 = vpack.c.bf16 %v328_v14, %v326_v47 }
 0x114   :  { %582 = vmatprep.subr.bf16.mxu0 %v331_v6 }
 0x115   :  { %583 = vmatpush1.bf16.msra.mxu0 %v330_v7 }
 0x116   :  { %v490_v54 = vpop.permute.xlu1 %489  ;;  %v488_v55 = vpop.permute.xlu0 %487 }
 0x117   :  { %v492_v4 = vsel %vm310_vm8, %v486_v49, %v490_v54  ;;  %v494_v57 = vsel %vm310_vm8, %v490_v54, %v486_v49  ;;  %v491_v58 = vsel %vm310_vm8, %v484_v50, %v488_v55  ;;  %v493_v59 = vsel %vm310_vm8, %v488_v55, %v484_v50  ;;  %v1242_v49 = vld [vmem:[#allocation6 + $0x4] ss:$8 sps:$4 sm:$0xff]  }
 0x118   :  { %v497_v60 = vmul.f32 %v492_v4, %v1806_v1  ;;  %v498_v61 = vmul.f32 %v494_v57, %v1809_v3  ;;  %v495_v62 = vmul.f32 %v491_v58, %v1806_v1  ;;  %v496_v63 = vmul.f32 %v493_v59, %v1809_v3  ;;  %599 = vmatmul.mubr.bf16.vlgmr.msra.gmra.mrb[0].mxu0 %v1239_v53  ;;  %v1124_v54 = vld [vmem:[%s2323_s4] sm:$0xff]  ;;  %v1125_v4 = vld [vmem:[%s2323_s4 + $0x8] sm:$0xff]  ;;  %s1331_s4 = smov [#allocation8]  }
 0x119   :  { %1220 = vmatprep.mubr.msk.bf16.mxu0 %vm562_vm0, %v1242_v49 }
 0x11a   :  { %v500_v12 = vpack.c.bf16 %v498_v61, %v496_v63  ;;  %v499_v13 = vpack.c.bf16 %v497_v60, %v495_v62 }
 0x11c   :  { %625 = vmatprep.subr.bf16.mxu1 %v500_v12 }
 0x11d   :  { %626 = vmatpush1.bf16.msra.mxu1 %v499_v13 }
 0x120   :  { %642 = vmatmul.mubr.bf16.vlgmr.msra.gmra.mrb[0].mxu1 %v1239_v53 }
 0x121   :  { %1221 = vmatprep.mubr.msk.bf16.mxu1 %vm562_vm0, %v1242_v49 }
 0x127   :  { %v551_v18 = vpop.permute.xlu1 %550 }
 0x128   :  { %v546_v15 = vpop.permute.xlu0 %545 }
 0x1eb   :  { %v600_v16 = vpop.f32.mrb[0].mxu0 }
 0x1ec   :  { %v602_v20 = vpop.f32.mrb[1].mxu0  ;;  %v601_v21 = vadd.f32 %v600_v16, %v546_v15 }
 0x1ed   :  { %v604_v22 = vpop.f32.mrb[2].mxu0  ;;  %v603_v39 = vadd.f32 %v602_v20, %v546_v15 }
 0x1ee   :  { %v605_v23 = vadd.f32 %v604_v22, %v551_v18  ;;  %v1838_v24 = vmax.f32 %v601_v21, 0.0  ;;  %v606_v25 = vpop.f32.mrb[3].mxu0 }
 0x1ef   :  { %v607_v40 = vadd.f32 %v606_v25, %v551_v18  ;;  %v1912_v41 = vmax.f32 %v603_v39, 0.0 }
 0x1f0   :  { %v1840_v28 = vmax.f32 %v605_v23, 0.0  ;;  %660 = vrot.lane.b32.xlu1 %v1838_v24, %s1323_s24 }
 0x1f1   :  { %v1916_v43 = vmax.f32 %v607_v40, 0.0 }
 0x1f2   :  { %662 = vrot.lane.b32.xlu0 %v1840_v28, %s1323_s24 }
 0x1f3   :  { %v643_v30 = vpop.f32.mrb[0].mxu1 }
 0x1f4   :  { %v644_v33 = vadd.f32 %v643_v30, %v546_v15  ;;  %v645_v34 = vpop.f32.mrb[1].mxu1 }
 0x1f5   :  { %v647_v35 = vpop.f32.mrb[2].mxu1  ;;  %v646_v42 = vadd.f32 %v645_v34, %v546_v15 }
 0x1f6   :  { %v1848_v36 = vmax.f32 %v644_v33, 0.0  ;;  %v648_v37 = vadd.f32 %v647_v35, %v551_v18  ;;  %v649_v0 = vpop.f32.mrb[3].mxu1 }
 0x1f7   :  { %v650_v44 = vadd.f32 %v649_v0, %v551_v18  ;;  %v1920_v14 = vmax.f32 %v646_v42, 0.0 }
 0x1f8   :  { %v1850_v2 = vmax.f32 %v648_v37, 0.0  ;;  %824 = vrot.lane.b32.xlu1 %v1848_v36, %s1323_s24 }
 0x1f9   :  { %v1924_v11 = vmax.f32 %v650_v44, 0.0 }
 0x1fa   :  { %826 = vrot.lane.b32.xlu0 %v1850_v2, %s1323_s24 }
 0x1fc   :  { %680 = vrot.lane.b32.xlu1 %v1838_v24, %s1319_s8 }
 0x1fe   :  { %682 = vrot.lane.b32.xlu0 %v1840_v28, %s1319_s8 }
 0x200   :  { %844 = vrot.lane.b32.xlu1 %v1848_v36, %s1319_s8 }
 0x202   :  { %846 = vrot.lane.b32.xlu0 %v1850_v2, %s1319_s8 }
 0x204   :  { %700 = vrot.lane.b32.xlu1 %v1838_v24, %s1324_s3 }
 0x206   :  { %702 = vrot.lane.b32.xlu0 %v1840_v28, %s1324_s3 }
 0x208   :  { %864 = vrot.lane.b32.xlu1 %v1848_v36, %s1324_s3 }
 0x20a   :  { %866 = vrot.lane.b32.xlu0 %v1850_v2, %s1324_s3 }
 0x20c   :  { %720 = vrot.lane.b32.xlu1 %v1838_v24, %s1325_s25 }
 0x20e   :  { %722 = vrot.lane.b32.xlu0 %v1840_v28, %s1325_s25 }
 0x210   :  { %884 = vrot.lane.b32.xlu1 %v1848_v36, %s1325_s25 }
 0x212   :  { %886 = vrot.lane.b32.xlu0 %v1850_v2, %s1325_s25 }
 0x214   :  { %744 = vrot.lane.b32.xlu1 %v1838_v24, %s1326_s26 }
 0x216   :  { %746 = vrot.lane.b32.xlu0 %v1840_v28, %s1326_s26 }
 0x218   :  { %908 = vrot.lane.b32.xlu1 %v1848_v36, %s1326_s26 }
 0x21a   :  { %910 = vrot.lane.b32.xlu0 %v1850_v2, %s1326_s26 }
 0x21c   :  { %764 = vrot.lane.b32.xlu1 %v1838_v24, %s1327_s27 }
 0x21e   :  { %766 = vrot.lane.b32.xlu0 %v1840_v28, %s1327_s27 }
 0x220   :  { %928 = vrot.lane.b32.xlu1 %v1848_v36, %s1327_s27 }
 0x222   :  { %930 = vrot.lane.b32.xlu0 %v1850_v2, %s1327_s27 }
 0x224   :  { %784 = vrot.lane.b32.xlu1 %v1838_v24, %s1328_s28 }
 0x226   :  { %786 = vrot.lane.b32.xlu0 %v1840_v28, %s1328_s28 }
 0x228   :  { %948 = vrot.lane.b32.xlu1 %v1848_v36, %s1328_s28 }
 0x22a   :  { %950 = vrot.lane.b32.xlu0 %v1850_v2, %s1328_s28 }
 0x22c   :  { %804 = vrot.lane.b32.xlu1 %v1838_v24, %s1329_s9 }
 0x22e   :  { %806 = vrot.lane.b32.xlu0 %v1840_v28, %s1329_s9 }
 0x230   :  { %968 = vrot.lane.b32.xlu1 %v1848_v36, %s1329_s9 }
 0x232   :  { %970 = vrot.lane.b32.xlu0 %v1850_v2, %s1329_s9 }
 0x234   :  { %664 = vrot.lane.b32.xlu1 %v1912_v41, %s1323_s24 }
 0x236   :  { %666 = vrot.lane.b32.xlu0 %v1916_v43, %s1323_s24 }
 0x238   :  { %828 = vrot.lane.b32.xlu1 %v1920_v14, %s1323_s24 }
 0x23a   :  { %830 = vrot.lane.b32.xlu0 %v1924_v11, %s1323_s24 }
 0x23c   :  { %684 = vrot.lane.b32.xlu1 %v1912_v41, %s1319_s8 }
 0x23e   :  { %686 = vrot.lane.b32.xlu0 %v1916_v43, %s1319_s8 }
 0x240   :  { %848 = vrot.lane.b32.xlu1 %v1920_v14, %s1319_s8 }
 0x242   :  { %850 = vrot.lane.b32.xlu0 %v1924_v11, %s1319_s8 }
 0x244   :  { %704 = vrot.lane.b32.xlu1 %v1912_v41, %s1324_s3 }
 0x246   :  { %706 = vrot.lane.b32.xlu0 %v1916_v43, %s1324_s3 }
 0x248   :  { %868 = vrot.lane.b32.xlu1 %v1920_v14, %s1324_s3 }
 0x24a   :  { %870 = vrot.lane.b32.xlu0 %v1924_v11, %s1324_s3 }
 0x24c   :  { %724 = vrot.lane.b32.xlu1 %v1912_v41, %s1325_s25 }
 0x24e   :  { %726 = vrot.lane.b32.xlu0 %v1916_v43, %s1325_s25 }
 0x250   :  { %888 = vrot.lane.b32.xlu1 %v1920_v14, %s1325_s25 }
 0x252   :  { %890 = vrot.lane.b32.xlu0 %v1924_v11, %s1325_s25 }
 0x254   :  { %748 = vrot.lane.b32.xlu1 %v1912_v41, %s1326_s26 }
 0x256   :  { %750 = vrot.lane.b32.xlu0 %v1916_v43, %s1326_s26 }
 0x258   :  { %912 = vrot.lane.b32.xlu1 %v1920_v14, %s1326_s26 }
 0x25a   :  { %914 = vrot.lane.b32.xlu0 %v1924_v11, %s1326_s26  ;;  %s1194_s26 = sshll.u32 %s1331_s4, 4  ;;  %s1195_s26 = int_to_ptr.vmem [resolvable:$true] %s1194_s26 }
 0x25b   :  { %p1294_p3 = scmp.lt.s32.totalorder %s1195_s26, %s1195_s26 }
 0x25c   :  { %768 = vrot.lane.b32.xlu1 %v1912_v41, %s1327_s27 }
 0x25e   :  { %770 = vrot.lane.b32.xlu0 %v1916_v43, %s1327_s27 }
 0x260   :  { %932 = vrot.lane.b32.xlu1 %v1920_v14, %s1327_s27 }
 0x262   :  { %934 = vrot.lane.b32.xlu0 %v1924_v11, %s1327_s27  ;;  %v661_v47 = vpop.permute.xlu1 %660  ;;  %s1289_s27 = scalar_lea.vmem %s1195_s26, 1024 }
 0x263   :  { %p1290_p2 = scmp.ne.s32.totalorder %s1195_s26, %s1289_s27  ;;  %p1295_p4 = scmp.lt.s32.totalorder %s1289_s27, %s1289_s27 }
 0x264   :  { %788 = vrot.lane.b32.xlu1 %v1912_v41, %s1328_s28  ;;  %v663_v48 = vpop.permute.xlu0 %662 }
 0x265   :  { %p1296_p5 = por %p1295_p4, %p1294_p3 }
 0x266   :  { %790 = vrot.lane.b32.xlu0 %v1916_v43, %s1328_s28 }
 0x267   :  { %p1297_p6 = pnand %p1296_p5, %p1290_p2 }
 0x268   :  { %952 = vrot.lane.b32.xlu1 %v1920_v14, %s1328_s28 }
 0x26a   :  { %954 = vrot.lane.b32.xlu0 %v1924_v11, %s1328_s28  ;;  %v825_v50 = vpop.permute.xlu1 %824 }
 0x26c   :  { %v827_v6 = vpop.permute.xlu0 %826  ;;  %808 = vrot.lane.b32.xlu1 %v1912_v41, %s1329_s9 }
 0x26e   :  { %810 = vrot.lane.b32.xlu0 %v1916_v43, %s1329_s9  ;;  %v681_v7 = vpop.permute.xlu1 %680 }
 0x270   :  { %v1984_v53 = vpop.permute.xlu0 %682  ;;  %972 = vrot.lane.b32.xlu1 %v1920_v14, %s1329_s9 }
 0x272   :  { %974 = vrot.lane.b32.xlu0 %v1924_v11, %s1329_s9  ;;  %v1993_v55 = vpop.permute.xlu1 %844 }
 0x274   :  { %v1998_v57 = vpop.permute.xlu0 %846  ;;  %1128 = vperm.xlu1 %1238, %v1124_v54  }
 0x276   :  { %1133 = vperm.xlu0 %1237, %v1125_v4   ;;  %v2000_v58 = vpop.permute.xlu1 %700 }
 0x278   :  { %v2002_v59 = vpop.permute.xlu0 %702  ;;  %1160 = vperm.xlu1 %1238, %v1124_v54  }
 0x27a   :  { %1165 = vperm.xlu0 %1237, %v1125_v4   ;;  %v2004_v60 = vpop.permute.xlu1 %864 }
 0x27c   :  { %v2006_v61 = vpop.permute.xlu0 %866 }
 0x27e   :  { %v2008_v62 = vpop.permute.xlu1 %720 }
 0x280   :  { %v2010_v63 = vpop.permute.xlu0 %722 }
 0x282   :  { %v2012_v12 = vpop.permute.xlu1 %884 }
 0x284   :  { %v2014_v13 = vpop.permute.xlu0 %886 }
 0x286   :  { %v2016_v15 = vpop.permute.xlu1 %744 }
 0x288   :  { %v2018_v16 = vpop.permute.xlu0 %746 }
 0x28a   :  { %v2020_v18 = vpop.permute.xlu1 %908 }
 0x28c   :  { %v2022_v20 = vpop.permute.xlu0 %910 }
 0x28e   :  { %v2024_v21 = vpop.permute.xlu1 %764 }
 0x290   :  { %v2026_v22 = vpop.permute.xlu0 %766 }
 0x292   :  { %v2028_v23 = vpop.permute.xlu1 %928 }
 0x294   :  { %v2030_v25 = vpop.permute.xlu0 %930 }
 0x296   :  { %v2032_v30 = vpop.permute.xlu1 %784 }
 0x298   :  { %v2034_v33 = vpop.permute.xlu0 %786 }
 0x29a   :  { %v2036_v34 = vpop.permute.xlu1 %948 }
 0x29b   :  { %2338 = vst [vmem:[#allocation14_spill] sm:$0xff] %v2036_v34 }
 0x29c   :  { %v2038_v35 = vpop.permute.xlu0 %950 }
 0x29d   :  { %2339 = vst [vmem:[#allocation15_spill] sm:$0xff] %v2038_v35 }
 0x29e   :  { %v2040_v37 = vpop.permute.xlu1 %804 }
 0x29f   :  { %2340 = vst [vmem:[#allocation16_spill] sm:$0xff] %v2040_v37 }
 0x2a0   :  { %v2042_v0 = vpop.permute.xlu0 %806 }
 0x2a1   :  { %2341 = vst [vmem:[#allocation17_spill] sm:$0xff] %v2042_v0 }
 0x2a2   :  { %v2044_v39 = vpop.permute.xlu1 %968 }
 0x2a3   :  { %2342 = vst [vmem:[#allocation18_spill] sm:$0xff] %v2044_v39 }
 0x2a4   :  { %v2046_v40 = vpop.permute.xlu0 %970 }
 0x2a5   :  { %2343 = vst [vmem:[#allocation19_spill] sm:$0xff] %v2046_v40 }
 0x2a6   :  { %v665_v42 = vpop.permute.xlu1 %664 }
 0x2a7   :  { %v668_v44 = vsel %vm82_vm1, %v661_v47, %v665_v42  ;;  %v670_v49 = vsel %vm82_vm1, %v665_v42, %v661_v47 }
 0x2a8   :  { %v667_v54 = vpop.permute.xlu0 %666  ;;  %v672_v29 = vmul.f32 %v670_v49, %v1551_v19  ;;  %v673_v39 = vmul.f32 %v668_v44, %v1542_v17 }
 0x2a9   :  { %v669_v4 = vsel %vm82_vm1, %v663_v48, %v667_v54  ;;  %v671_v38 = vsel %vm82_vm1, %v667_v54, %v663_v48 }
 0x2aa   :  { %v674_v40 = vmul.f32 %v671_v38, %v1551_v19  ;;  %v675_v3 = vmul.f32 %v669_v4, %v1542_v17  ;;  %v829_v1 = vpop.permute.xlu1 %828 }
 0x2ab   :  { %v832_v0 = vsel %vm82_vm1, %v825_v50, %v829_v1  ;;  %v834_v47 = vsel %vm82_vm1, %v829_v1, %v825_v50 }
 0x2ac   :  { %v676_v42 = vpack.c.bf16 %v674_v40, %v672_v29  ;;  %v831_v37 = vpop.permute.xlu0 %830  ;;  %v677_v35 = vpack.c.bf16 %v675_v3, %v673_v39  ;;  %v836_v38 = vmul.f32 %v834_v47, %v1551_v19  ;;  %v837_v49 = vmul.f32 %v832_v0, %v1542_v17 }
 0x2ad   :  { %v833_v48 = vsel %vm82_vm1, %v827_v6, %v831_v37  ;;  %v835_v44 = vsel %vm82_vm1, %v831_v37, %v827_v6 }
 0x2ae   :  { %v838_v54 = vmul.f32 %v835_v44, %v1551_v19  ;;  %v839_v4 = vmul.f32 %v833_v48, %v1542_v17  ;;  %1038 = vmatprep.subr.bf16.mxu0 %v677_v35  ;;  %v685_v34 = vpop.permute.xlu1 %684 }
 0x2af   :  { %v688_v1 = vsel %vm114_vm2, %v681_v7, %v685_v34  ;;  %v690_v3 = vsel %vm114_vm2, %v685_v34, %v681_v7  ;;  %1039 = vmatpush1.bf16.msra.mxu0 %v676_v42 }
 0x2b0   :  { %v840_v29 = vpack.c.bf16 %v838_v54, %v836_v38  ;;  %v687_v50 = vpop.permute.xlu0 %686  ;;  %v841_v6 = vpack.c.bf16 %v839_v4, %v837_v49  ;;  %v692_v19 = vmul.f32 %v690_v3, %v1594_v51  ;;  %v693_v35 = vmul.f32 %v688_v1, %v1597_v52 }
 0x2b1   :  { %v689_v37 = vsel %vm114_vm2, %v1984_v53, %v687_v50  ;;  %v691_v17 = vsel %vm114_vm2, %v687_v50, %v1984_v53 }
 0x2b2   :  { %v694_v0 = vmul.f32 %v691_v17, %v1594_v51  ;;  %v695_v7 = vmul.f32 %v689_v37, %v1597_v52  ;;  %1081 = vmatprep.subr.bf16.mxu1 %v841_v6  ;;  %v849_v34 = vpop.permute.xlu1 %848 }
 0x2b3   :  { %v852_v39 = vsel %vm114_vm2, %v1993_v55, %v849_v34  ;;  %v854_v40 = vsel %vm114_vm2, %v849_v34, %v1993_v55  ;;  %1082 = vmatpush1.bf16.msra.mxu1 %v840_v29 }
 0x2b4   :  { %v696_v53 = vpack.c.bf16 %v694_v0, %v692_v19  ;;  %v851_v47 = vpop.permute.xlu0 %850  ;;  %v697_v42 = vpack.c.bf16 %v695_v7, %v693_v35  ;;  %v856_v38 = vmul.f32 %v854_v40, %v1594_v51  ;;  %v857_v49 = vmul.f32 %v852_v39, %v1597_v52 }
 0x2b5   :  { %v853_v48 = vsel %vm114_vm2, %v1998_v57, %v851_v47  ;;  %v855_v44 = vsel %vm114_vm2, %v851_v47, %v1998_v57 }
 0x2b6   :  { %v858_v54 = vmul.f32 %v855_v44, %v1594_v51  ;;  %v859_v55 = vmul.f32 %v853_v48, %v1597_v52  ;;  %1040 = vmatprep.subr.bf16.mxu0 %v697_v42  ;;  %v705_v4 = vpop.permute.xlu1 %704 }
 0x2b7   :  { %v708_v1 = vsel %vm146_vm3, %v2000_v58, %v705_v4  ;;  %v710_v3 = vsel %vm146_vm3, %v705_v4, %v2000_v58  ;;  %1041 = vmatpush1.bf16.msra.mxu0 %v696_v53 }
 0x2b8   :  { %v860_v57 = vpack.c.bf16 %v858_v54, %v856_v38  ;;  %v707_v29 = vpop.permute.xlu0 %706  ;;  %v861_v50 = vpack.c.bf16 %v859_v55, %v857_v49  ;;  %v712_v6 = vmul.f32 %v710_v3, %v1628_v31  ;;  %v713_v37 = vmul.f32 %v708_v1, %v1631_v32 }
 0x2b9   :  { %v709_v51 = vsel %vm146_vm3, %v2002_v59, %v707_v29  ;;  %v711_v52 = vsel %vm146_vm3, %v707_v29, %v2002_v59 }
 0x2ba   :  { %v714_v17 = vmul.f32 %v711_v52, %v1628_v31  ;;  %v715_v58 = vmul.f32 %v709_v51, %v1631_v32  ;;  %1083 = vmatprep.subr.bf16.mxu1 %v861_v50  ;;  %v869_v19 = vpop.permute.xlu1 %868 }
 0x2bb   :  { %v872_v35 = vsel %vm146_vm3, %v2004_v60, %v869_v19  ;;  %v874_v0 = vsel %vm146_vm3, %v869_v19, %v2004_v60  ;;  %1084 = vmatpush1.bf16.msra.mxu1 %v860_v57 }
 0x2bc   :  { %v716_v59 = vpack.c.bf16 %v714_v17, %v712_v6  ;;  %v871_v7 = vpop.permute.xlu0 %870  ;;  %v717_v34 = vpack.c.bf16 %v715_v58, %v713_v37  ;;  %v876_v53 = vmul.f32 %v874_v0, %v1628_v31  ;;  %v877_v47 = vmul.f32 %v872_v35, %v1631_v32 }
 0x2bd   :  { %v873_v39 = vsel %vm146_vm3, %v2006_v61, %v871_v7  ;;  %v875_v40 = vsel %vm146_vm3, %v871_v7, %v2006_v61  ;;  %v741_v37 = vpack.c.bf16 %v1916_v43, %v1912_v41  ;;  %v905_v7 = vpack.c.bf16 %v1924_v11, %v1920_v14 }
 0x2be   :  { %v878_v42 = vmul.f32 %v875_v40, %v1628_v31  ;;  %v879_v60 = vmul.f32 %v873_v39, %v1631_v32  ;;  %1042 = vmatprep.subr.bf16.mxu0 %v717_v34  ;;  %v725_v48 = vpop.permute.xlu1 %724  ;;  %v2344_v14 = vpack.c.bf16 %v1840_v28, %v1838_v24 }
 0x2bf   :  { %v728_v44 = vsel %vm178_vm4, %v2008_v62, %v725_v48  ;;  %v730_v38 = vsel %vm178_vm4, %v725_v48, %v2008_v62  ;;  %1043 = vmatpush1.bf16.msra.mxu0 %v716_v59 }
 0x2c0   :  { %v880_v61 = vpack.c.bf16 %v878_v42, %v876_v53  ;;  %v727_v49 = vpop.permute.xlu0 %726  ;;  %v881_v54 = vpack.c.bf16 %v879_v60, %v877_v47  ;;  %v732_v55 = vmul.f32 %v730_v38, %v1662_v8  ;;  %v733_v4 = vmul.f32 %v728_v44, %v1665_v9 }
 0x2c1   :  { %v729_v31 = vsel %vm178_vm4, %v2010_v63, %v727_v49  ;;  %v731_v32 = vsel %vm178_vm4, %v727_v49, %v2010_v63 }
 0x2c2   :  { %v734_v1 = vmul.f32 %v731_v32, %v1662_v8  ;;  %v735_v62 = vmul.f32 %v729_v31, %v1665_v9  ;;  %1085 = vmatprep.subr.bf16.mxu1 %v881_v54  ;;  %v889_v3 = vpop.permute.xlu1 %888 }
 0x2c3   :  { %v892_v57 = vsel %vm178_vm4, %v2012_v12, %v889_v3  ;;  %v894_v29 = vsel %vm178_vm4, %v889_v3, %v2012_v12  ;;  %1086 = vmatpush1.bf16.msra.mxu1 %v880_v61 }
 0x2c4   :  { %v736_v63 = vpack.c.bf16 %v734_v1, %v732_v55  ;;  %v891_v50 = vpop.permute.xlu0 %890  ;;  %v737_v51 = vpack.c.bf16 %v735_v62, %v733_v4  ;;  %v896_v17 = vmul.f32 %v894_v29, %v1662_v8  ;;  %v897_v58 = vmul.f32 %v892_v57, %v1665_v9 }
 0x2c5   :  { %v893_v52 = vsel %vm178_vm4, %v2014_v13, %v891_v50  ;;  %v895_v6 = vsel %vm178_vm4, %v891_v50, %v2014_v13 }
 0x2c6   :  { %v898_v12 = vmul.f32 %v895_v6, %v1662_v8  ;;  %v899_v19 = vmul.f32 %v893_v52, %v1665_v9  ;;  %1044 = vmatprep.subr.bf16.mxu0 %v737_v51  ;;  %v749_v35 = vpop.permute.xlu1 %748 }
 0x2c7   :  { %v752_v0 = vsel %vm214_vm5, %v2016_v15, %v749_v35  ;;  %v754_v13 = vsel %vm214_vm5, %v749_v35, %v2016_v15  ;;  %1045 = vmatpush1.bf16.msra.mxu0 %v736_v63 }
 0x2c8   :  { %v900_v41 = vpack.c.bf16 %v898_v12, %v896_v17  ;;  %v751_v43 = vpop.permute.xlu0 %750  ;;  %1046 = vmatprep.subr.bf16.mxu0 %v741_v37  ;;  %v901_v59 = vpack.c.bf16 %v899_v19, %v897_v58  ;;  %v756_v34 = vmul.f32 %v752_v0, %v1702_v45  ;;  %v757_v15 = vmul.f32 %v754_v13, %v1705_v46 }
 0x2c9   :  { %v753_v8 = vsel %vm214_vm5, %v2018_v16, %v751_v43  ;;  %v755_v9 = vsel %vm214_vm5, %v751_v43, %v2018_v16  ;;  %v2346_v43 = vld [vmem:[#allocation14_spill] sm:$0xff] }
 0x2ca   :  { %v758_v39 = vmul.f32 %v753_v8, %v1702_v45  ;;  %v759_v40 = vmul.f32 %v755_v9, %v1705_v46  ;;  %1087 = vmatprep.subr.bf16.mxu1 %v901_v59  ;;  %v913_v53 = vpop.permute.xlu1 %912 }
 0x2cb   :  { %v916_v47 = vsel %vm214_vm5, %v2020_v18, %v913_v53  ;;  %v918_v16 = vsel %vm214_vm5, %v913_v53, %v2020_v18  ;;  %1047 = vmatpush1.bf16.msra.mxu0 %v2344_v14  ;;  %1088 = vmatpush1.bf16.msra.mxu1 %v900_v41 }
 0x2cc   :  { %v760_v11 = vpack.c.bf16 %v758_v39, %v756_v34  ;;  %v915_v42 = vpop.permute.xlu0 %914  ;;  %1089 = vmatprep.subr.bf16.mxu1 %v905_v7  ;;  %v761_v60 = vpack.c.bf16 %v759_v40, %v757_v15  ;;  %v920_v38 = vmul.f32 %v916_v47, %v1702_v45  ;;  %v921_v18 = vmul.f32 %v918_v16, %v1705_v46  ;;  %v2347_v34 = vld [vmem:[#allocation15_spill] sm:$0xff] }
 0x2cd   :  { %v917_v48 = vsel %vm214_vm5, %v2022_v20, %v915_v42  ;;  %v919_v44 = vsel %vm214_vm5, %v915_v42, %v2022_v20  ;;  %v2345_v20 = vpack.c.bf16 %v1850_v2, %v1848_v36 }
 0x2ce   :  { %v922_v24 = vmul.f32 %v917_v48, %v1702_v45  ;;  %v923_v28 = vmul.f32 %v919_v44, %v1705_v46  ;;  %v769_v61 = vpop.permute.xlu1 %768  ;;  %1048 = vmatprep.subr.bf16.mxu0 %v761_v60 }
 0x2cf   :  { %v772_v49 = vsel %vm246_vm6, %v2024_v21, %v769_v61  ;;  %v774_v54 = vsel %vm246_vm6, %v769_v61, %v2024_v21  ;;  %1049 = vmatpush1.bf16.msra.mxu0 %v760_v11  ;;  %1090 = vmatpush1.bf16.msra.mxu1 %v2345_v20  ;;  %v2348_v11 = vld [vmem:[#allocation16_spill] sm:$0xff]  ;;  %v2351_v61 = vld [vmem:[#allocation13_spill] sm:$0xff] }
 0x2d0   :  { %v924_v31 = vpack.c.bf16 %v922_v24, %v920_v38  ;;  %v771_v32 = vpop.permute.xlu0 %770  ;;  %v925_v45 = vpack.c.bf16 %v923_v28, %v921_v18  ;;  %v776_v4 = vmul.f32 %v772_v49, %v1738_v26  ;;  %v777_v21 = vmul.f32 %v774_v54, %v1741_v27  ;;  %v2349_v18 = vld [vmem:[#allocation17_spill] sm:$0xff]  ;;  %v2350_v24 = vld [vmem:[#allocation12_spill] sm:$0xff] }
 0x2d1   :  { %v773_v46 = vsel %vm246_vm6, %v2026_v22, %v771_v32  ;;  %v775_v55 = vsel %vm246_vm6, %v771_v32, %v2026_v22  ;;  %v2352_v32 = vld [vmem:[#allocation18_spill] sm:$0xff] }
 0x2d2   :  { %v778_v1 = vmul.f32 %v773_v46, %v1738_v26  ;;  %v779_v36 = vmul.f32 %v775_v55, %v1741_v27  ;;  %1091 = vmatprep.subr.bf16.mxu1 %v925_v45  ;;  %v933_v2 = vpop.permute.xlu1 %932 }
 0x2d3   :  { %v936_v62 = vsel %vm246_vm6, %v2028_v23, %v933_v2  ;;  %v938_v3 = vsel %vm246_vm6, %v933_v2, %v2028_v23  ;;  %1092 = vmatpush1.bf16.msra.mxu1 %v924_v31 }
 0x2d4   :  { %v780_v22 = vpack.c.bf16 %v778_v1, %v776_v4  ;;  %v935_v57 = vpop.permute.xlu0 %934  ;;  %v781_v29 = vpack.c.bf16 %v779_v36, %v777_v21  ;;  %v940_v51 = vmul.f32 %v936_v62, %v1738_v26  ;;  %v941_v52 = vmul.f32 %v938_v3, %v1741_v27  ;;  %v2353_v1 = vld [vmem:[#allocation19_spill] sm:$0xff] }
 0x2d5   :  { %v937_v63 = vsel %vm246_vm6, %v2030_v25, %v935_v57  ;;  %v939_v50 = vsel %vm246_vm6, %v935_v57, %v2030_v25 }
 0x2d6   :  { %v942_v6 = vmul.f32 %v937_v63, %v1738_v26  ;;  %v943_v23 = vmul.f32 %v939_v50, %v1741_v27  ;;  %v789_v37 = vpop.permute.xlu1 %788  ;;  %1050 = vmatprep.subr.bf16.mxu0 %v781_v29  ;;  %v1244_v29 = vld [vmem:[#allocation6] ss:$8 sps:$4 sm:$0xff]  }
 0x2d7   :  { %v792_v17 = vsel %vm278_vm7, %v2032_v30, %v789_v37  ;;  %v794_v58 = vsel %vm278_vm7, %v789_v37, %v2032_v30  ;;  %1051 = vmatpush1.bf16.msra.mxu0 %v780_v22 }
 0x2d8   :  { %v944_v25 = vpack.c.bf16 %v942_v6, %v940_v51  ;;  %v791_v12 = vpop.permute.xlu0 %790  ;;  %v945_v19 = vpack.c.bf16 %v943_v23, %v941_v52  ;;  %v796_v35 = vmul.f32 %v792_v17, %v1772_v5  ;;  %v797_v0 = vmul.f32 %v794_v58, %v1775_v56  ;;  %v1140_v6 = vld [vmem:[#allocation3] sm:$0xff]  ;;  %v1141_v17 = vld [vmem:[#allocation3 + $0x8] sm:$0xff] }
 0x2d9   :  { %v793_v26 = vsel %vm278_vm7, %v2034_v33, %v791_v12  ;;  %v795_v27 = vsel %vm278_vm7, %v791_v12, %v2034_v33  ;;  %v1142_v12 = vld [vmem:[#allocation3 + $0x10] sm:$0xff] }
 0x2da   :  { %v798_v13 = vmul.f32 %v793_v26, %v1772_v5  ;;  %v799_v30 = vmul.f32 %v795_v27, %v1775_v56  ;;  %1093 = vmatprep.subr.bf16.mxu1 %v945_v19  ;;  %v953_v41 = vpop.permute.xlu1 %952 }
 0x2db   :  { %v956_v59 = vsel %vm278_vm7, %v2346_v43, %v953_v41  ;;  %v958_v8 = vsel %vm278_vm7, %v953_v41, %v2346_v43  ;;  %1094 = vmatpush1.bf16.msra.mxu1 %v944_v25  ;;  %v1172_v43 = vld [vmem:[#allocation3 + $0x20] sm:$0xff] }
 0x2dc   :  { %v800_v33 = vpack.c.bf16 %v798_v13, %v796_v35  ;;  %v955_v9 = vpop.permute.xlu0 %954  ;;  %v801_v7 = vpack.c.bf16 %v799_v30, %v797_v0  ;;  %v960_v40 = vmul.f32 %v956_v59, %v1772_v5  ;;  %v961_v53 = vmul.f32 %v958_v8, %v1775_v56  ;;  %v1143_v35 = vld [vmem:[#allocation3 + $0x18] sm:$0xff] }
 0x2dd   :  { %v957_v15 = vsel %vm278_vm7, %v2347_v34, %v955_v9  ;;  %v959_v39 = vsel %vm278_vm7, %v955_v9, %v2347_v34 }
 0x2de   :  { %v962_v47 = vmul.f32 %v957_v15, %v1772_v5  ;;  %v963_v16 = vmul.f32 %v959_v39, %v1775_v56  ;;  %v809_v14 = vpop.permute.xlu1 %808  ;;  %1052 = vmatprep.subr.bf16.mxu0 %v801_v7  ;;  %v1173_v7 = vld [vmem:[#allocation3 + $0x28] sm:$0xff] }
 0x2df   :  { %v812_v42 = vsel %vm310_vm8, %v2348_v11, %v809_v14  ;;  %v814_v60 = vsel %vm310_vm8, %v809_v14, %v2348_v11  ;;  %1053 = vmatpush1.bf16.msra.mxu0 %v800_v33 }
 0x2e0   :  { %v964_v48 = vpack.c.bf16 %v962_v47, %v960_v40  ;;  %v811_v44 = vpop.permute.xlu0 %810  ;;  %v965_v38 = vpack.c.bf16 %v963_v16, %v961_v53  ;;  %v816_v28 = vmul.f32 %v812_v42, %v2350_v24  ;;  %v817_v49 = vmul.f32 %v814_v60, %v2351_v61  ;;  %v1174_v47 = vld [vmem:[#allocation3 + $0x30] sm:$0xff]  ;;  %v1175_v60 = vld [vmem:[#allocation3 + $0x38] sm:$0xff] }
 0x2e1   :  { %v813_v5 = vsel %vm310_vm8, %v2349_v18, %v811_v44  ;;  %v815_v56 = vsel %vm310_vm8, %v811_v44, %v2349_v18 }
 0x2e2   :  { %v818_v54 = vmul.f32 %v813_v5, %v2350_v24  ;;  %v819_v20 = vmul.f32 %v815_v56, %v2351_v61  ;;  %1095 = vmatprep.subr.bf16.mxu1 %v965_v38  ;;  %v973_v31 = vpop.permute.xlu1 %972 }
 0x2e3   :  { %v976_v45 = vsel %vm310_vm8, %v2352_v32, %v973_v31  ;;  %v978_v46 = vsel %vm310_vm8, %v973_v31, %v2352_v32  ;;  %1096 = vmatpush1.bf16.msra.mxu1 %v964_v48 }
 0x2e4   :  { %v820_v55 = vpack.c.bf16 %v818_v54, %v816_v28  ;;  %v975_v4 = vpop.permute.xlu0 %974  ;;  %v821_v21 = vpack.c.bf16 %v819_v20, %v817_v49  ;;  %v980_v62 = vmul.f32 %v976_v45, %v2350_v24  ;;  %v981_v3 = vmul.f32 %v978_v46, %v2351_v61 }
 0x2e5   :  { %v977_v36 = vsel %vm310_vm8, %v2353_v1, %v975_v4  ;;  %v979_v2 = vsel %vm310_vm8, %v975_v4, %v2353_v1 }
 0x2e6   :  { %v982_v22 = vmul.f32 %v977_v36, %v2350_v24  ;;  %v983_v57 = vmul.f32 %v979_v2, %v2351_v61  ;;  %1054 = vmatprep.subr.bf16.mxu0 %v821_v21 }
 0x2e7   :  { %1055 = vmatpush1.bf16.msra.mxu0 %v820_v55 }
 0x2e8   :  { %v984_v63 = vpack.c.bf16 %v982_v22, %v980_v62  ;;  %v985_v50 = vpack.c.bf16 %v983_v57, %v981_v3 }
 0x2ea   :  { %1071 = vmatmul.mubr.bf16.vlgmr.msra.gmra.mrb[4].mxu0 %v1244_v29  ;;  %1097 = vmatprep.subr.bf16.mxu1 %v985_v50 }
 0x2eb   :  { %1098 = vmatpush1.bf16.msra.mxu1 %v984_v63 }
 0x2ee   :  { %1114 = vmatmul.mubr.bf16.vlgmr.msra.gmra.mrb[4].mxu1 %v1244_v29 }
 0x2f3   :  { %v1129_v51 = vpop.permute.xlu1 %1128 }
 0x2f5   :  { %v1134_v10 = vpop.permute.xlu0 %1133 }
 0x2f7   :  { %v1161_v0 = vpop.permute.xlu1 %1160 }
 0x2f9   :  { %v1166_v34 = vpop.permute.xlu0 %1165 }
 0x3bd   :  { %v1072_v52 = vpop.f32.mrb[4].mxu0 }
 0x3be   :  { %v1136_v23 = vadd.f32 %v1129_v51, %v1072_v52  ;;  %v1074_v37 = vpop.f32.mrb[5].mxu0 }
 0x3bf   :  { %v1137_v58 = vadd.f32 %v1129_v51, %v1074_v37  ;;  %v1076_v25 = vpop.f32.mrb[6].mxu0 }
 0x3c0   :  { %v1144_v19 = vadd.f32 %v1140_v6, %v1136_v23  ;;  %v1138_v26 = vadd.f32 %v1134_v10, %v1076_v25  ;;  %v1078_v27 = vpop.f32.mrb[7].mxu0 }
 0x3c1   :  { %v1145_v13 = vadd.f32 %v1141_v17, %v1137_v58  ;;  %v1139_v30 = vadd.f32 %v1134_v10, %v1078_v27  ;;  %v1115_v41 = vpop.f32.mrb[4].mxu1 }
 0x3c2   :  { %v1148_v59 = vmax.f32 %v1144_v19, 0.0  ;;  %v1146_v8 = vadd.f32 %v1142_v12, %v1138_v26  ;;  %v1168_v33 = vadd.f32 %v1161_v0, %v1115_v41  ;;  %v1117_v9 = vpop.f32.mrb[5].mxu1 }
 0x3c3   :  { %v1149_v15 = vmax.f32 %v1145_v13, 0.0  ;;  %v1147_v39 = vadd.f32 %v1143_v35, %v1139_v30  ;;  %v1169_v40 = vadd.f32 %v1161_v0, %v1117_v9  ;;  %v1119_v53 = vpop.f32.mrb[6].mxu1 }
 0x3c4   :  { %1152 = vst [vmem:[#allocation8] sm:$0xff] %v1148_v59  ;;  %v1150_v16 = vmax.f32 %v1146_v8, 0.0  ;;  %v1176_v14 = vadd.f32 %v1172_v43, %v1168_v33  ;;  %v1170_v11 = vadd.f32 %v1166_v34, %v1119_v53  ;;  %v1121_v42 = vpop.f32.mrb[7].mxu1 }
 0x3c5   :  { %1153 = vst [vmem:[#allocation8 + $0x8] sm:$0xff] %v1149_v15  ;;  %v1151_v48 = vmax.f32 %v1147_v39, 0.0  ;;  %v1177_v44 = vadd.f32 %v1173_v7, %v1169_v40  ;;  %v1171_v38 = vadd.f32 %v1166_v34, %v1121_v42 }
 0x3c6   :  { %1154 = vst [vmem:[#allocation8 + $0x10] sm:$0xff] %v1150_v16  ;;  %v1180_v18 = vmax.f32 %v1176_v14, 0.0  ;;  %v1178_v5 = vadd.f32 %v1174_v47, %v1170_v11 }
 0x3c7   :  { %1155 = vst [vmem:[#allocation8 + $0x18] sm:$0xff] %v1151_v48  ;;  %v1181_v56 = vmax.f32 %v1177_v44, 0.0  ;;  %v1179_v24 = vadd.f32 %v1175_v60, %v1171_v38 }
 0x3c8   :  { %1185 = vst [vmem:[#allocation8 + $0x20] sm:$0xff] %v1180_v18  ;;  %v1182_v28 = vmax.f32 %v1178_v5, 0.0 }
 0x3c9   :  { %1186 = vst [vmem:[#allocation8 + $0x28] sm:$0xff] %v1181_v56  ;;  %v1183_v61 = vmax.f32 %v1179_v24, 0.0 }
 0x3ca   :  { %1187 = vst [vmem:[#allocation8 + $0x30] sm:$0xff] %v1182_v28 }
 0x3cb   :  { %1188 = vst [vmem:[#allocation8 + $0x38] sm:$0xff] %v1183_v61 }
 0x3cc   :  { %1300 = shalt.err (!%p1297_p6)
}
 0x3cd   :  { %s1301_s13 = scalar_lea.hbm %s2325_s6, 1024 }
 0x3ce   :  { %p1302_p7 = scmp.ne.s32.totalorder %s2325_s6, %s1301_s13  ;;  %p1305_p8 = scmp.lt.u32.totalorder %s1301_s13, %s2325_s6 }
 0x3d0   :  { %p1307_p9 = pnand %p1305_p8, %p1302_p7 }
 0x3d2   :  { %1310 = shalt.err (!%p1307_p9)
}
 0x3d3   :  { %1200 = dma.vmem_to_hbm [thread:$0]  %s1195_s26, 1024, %s2325_s6, [#allocation5], %s1318_s7, %s1318_s7, %s1319_s8  }
 0x3d4   :  { %1315 = dma.done.wait [#allocation5], 1024  }
 0x3d5   :  { %1316 = vsyncadd [#allocation5], 4294966272 }
 0x3d6   :  { %1204 = vsyncpa [#allocation4], 1 }
 0x3d7   :  { %1205 = vsyncpa [#allocation7], 1 }
 0x3d8   :  { %1206 = vsyncpa [#allocation5], 1 }

</bundles_post_ra>
